<compile_context>
chip_gen: v7x
topology: tpu7x:2x2x1
jax: 0.10.0
libtpu: 0.0.40
codegen_flags: <defaults>
</compile_context>

<pallas_src>
import functools
import math

import jax
import jax.numpy as jnp
from jax.experimental import pallas as pl
from jax.experimental.pallas import tpu as pltpu


# ----------------------------- Pallas kernel --------------------------------
def trunk_kernel(t_ref, w1_ref, b1_ref, w2_ref, b2_ref, w3_ref, b3_ref, o_ref,
                 *, compute_dtype):
    # t_ref: (1, TN) tile of inputs, batch on lanes.
    # wN_ref: (out, in) weights; bN_ref: (out, 1) biases (broadcast over lanes).
    cd = compute_dtype
    t = t_ref[...].astype(cd)                                    # (1, TN)

    # hidden layer 1: contraction length is 1 -> VPU broadcast mul-add, no MXU.
    z = jnp.tanh(w1_ref[...].astype(cd) * t + b1_ref[...].astype(cd))  # (H1, TN)

    # hidden layer 2: lane-dense MXU matmul, f32 accumulation.
    z = jnp.tanh(
        (jnp.dot(w2_ref[...].astype(cd), z, preferred_element_type=jnp.float32)
         + b2_ref[...]).astype(cd)
    )                                                            # (H2, TN)

    # output layer: linear, stored as f32 (torch semantics).
    o_ref[...] = (
        jnp.dot(w3_ref[...].astype(cd), z, preferred_element_type=jnp.float32)
        + b3_ref[...]
    ).astype(o_ref.dtype)                                        # (K, TN)


# --------------------------- per-chip planning -------------------------------
def _device_kind():
    try:
        return jax.devices()[0].device_kind.lower()
    except Exception:
        return ""


def _num_tensorcores():
    kind = _device_kind()
    # v7x: 2 TensorCores per chip share the pallas grid -> keep an even grid.
    # v5e/v6e: single TC -> extra grid steps are pure serial overhead.
    return 2 if ("v7" in kind or "7x" in kind) else 1


def _default_compute_dtype():
    kind = _device_kind()
    # v6e/v7x have bf16-native VPU/EUP -> bf16 tanh/matmul path.
    # v5e (and older / unknown chips) stay f32.
    if "v6" in kind or "v7" in kind or "7x" in kind:
        return jnp.bfloat16
    return jnp.float32


def _plan_tiles(n, num_cores, max_tile_n=32768):
    """Pick (num_tiles, n_pad, tile_n).

    Lane width per tile is a multiple of 128, the number of tiles is a
    multiple of the TensorCore count (core balance on v7x), and tile width is
    capped so per-tile activations stay a few MiB at most.
    """
    n_lane = -(-n // 128) * 128
    tiles = max(num_cores, -(-n_lane // max_tile_n))
    tiles = -(-tiles // num_cores) * num_cores
    quantum = 128 * tiles
    n_pad = -(-n // quantum) * quantum
    return tiles, n_pad, n_pad // tiles


# ------------------------------ forward pass --------------------------------
def trunk_forward_lanes(t, params, *, num_tiles=None, compute_dtype=None):
    """Trunk MLP forward; returns lane-major (K, N) output.

    This is the performance path: batch stays on lanes end-to-end, and when N
    is a multiple of the lane quantum (128 * num_tiles) there is no
    wrapper-side pad / slice / transpose.  Consumers that need torch's (N, K)
    can transpose (or better, fuse the transpose downstream).

    t: (N, 1) float32 input.
    params: [(W1, b1), (W2, b2), (W3, b3)] with W (out, in), b (out, 1).
    """
    (w1, b1), (w2, b2), (w3, b3) = params
    N = t.shape[0]
    K = w3.shape[0]

    if num_tiles is None:
        num_tiles = _num_tensorcores()
    if compute_dtype is None:
        compute_dtype = _default_compute_dtype()

    tiles, n_pad, tile_n = _plan_tiles(N, num_tiles)

    t_lane = t.reshape(1, N)                       # batch on lanes (free reshape)
    if n_pad != N:
        t_lane = jnp.pad(t_lane, ((0, 0), (0, n_pad - N)))

    kernel = functools.partial(trunk_kernel, compute_dtype=compute_dtype)

    def batch_map(i):
        return (0, i)

    def whole_map(i):
        return (0, 0)

    out = pl.pallas_call(
        kernel,
        out_shape=jax.ShapeDtypeStruct((K, n_pad), jnp.float32),
        grid_spec=pltpu.PrefetchScalarGridSpec(
            num_scalar_prefetch=0,
            grid=(tiles,),
            in_specs=[
                pl.BlockSpec((1, tile_n), batch_map),   # t tile (lane-dense)
                pl.BlockSpec(w1.shape, whole_map),      # W1 (H1, 1)
                pl.BlockSpec(b1.shape, whole_map),      # b1 (H1, 1)
                pl.BlockSpec(w2.shape, whole_map),      # W2 (H2, H1)
                pl.BlockSpec(b2.shape, whole_map),      # b2 (H2, 1)
                pl.BlockSpec(w3.shape, whole_map),      # W3 (K, H2)
                pl.BlockSpec(b3.shape, whole_map),      # b3 (K, 1)
            ],
            out_specs=pl.BlockSpec((K, tile_n), batch_map),
        ),
        compiler_params=pltpu.CompilerParams(
            dimension_semantics=("parallel",),
        ),
    )(t_lane, w1, b1, w2, b2, w3, b3)

    if n_pad != N:
        out = out[:, :N]
    return out


def trunk_forward(t, params, **kwargs):
    """Torch-compatible forward: (N, 1) -> (N, K).

    The transpose lives outside the kernel; prefer `trunk_forward_lanes` and
    fusing the transpose into the consumer when possible.
    """
    return trunk_forward_lanes(t, params, **kwargs).T


# ------------------------- parameter initialization --------------------------
def xavier_normal(key, fan_in, fan_out):
    # torch.nn.init.xavier_normal_: std = sqrt(2 / (fan_in + fan_out)).
    std = math.sqrt(2.0 / (fan_in + fan_out))
    # stored as (out, in), same as torch.nn.Linear.weight
    return std * jax.random.normal(key, (fan_out, fan_in), dtype=jnp.float32)


def init_trunk_params(key, layer_sizes, K):
    sizes = [1] + layer_sizes + [K]
    params = []
    keys = jax.random.split(key, len(sizes) - 1)
    for i in range(1, len(sizes)):
        w = xavier_normal(keys[i - 1], sizes[i - 1], sizes[i])       # (out, in)
        b = jnp.zeros((sizes[i], 1), dtype=jnp.float32)              # zeros_(bias)
        params.append((w, b))
    return params


# ------------------------------- reference -----------------------------------
def trunk_reference(t, params):
    # Pure-JAX reference in torch layout: z = act(z @ W.T + b).
    z = t
    for w, b in params[:-1]:
        z = jnp.tanh(z @ w.T + b.reshape(1, -1))
    w, b = params[-1]
    return z @ w.T + b.reshape(1, -1)


if __name__ == "__main__":
    # scalar input feature, two tanh hidden layers of width 32, K=8 outputs.
    layer_sizes = [32, 32]
    K = 8
    N = 4096   # multiple of 128 * num_tiles on every chip -> no pad / slice

    key = jax.random.PRNGKey(0)
    k_param, k_t = jax.random.split(key)

    params = init_trunk_params(k_param, layer_sizes, K)
    t = jax.random.normal(k_t, (N, 1), dtype=jnp.float32)

    compute_dtype = _default_compute_dtype()

    # Performance path: lane-major (K, N) output, no wrapper-side reshuffling.
    out_lanes = trunk_forward_lanes(t, params, compute_dtype=compute_dtype)
    out_lanes = jax.block_until_ready(out_lanes)

    ref = trunk_reference(t, params)
    assert out_lanes.shape == (K, N)

    if compute_dtype == jnp.bfloat16:
        atol, rtol = 3e-2, 2e-2     # bf16 tanh/matmul path on v6e/v7x
    else:
        atol, rtol = 1e-4, 1e-5     # f32 path (v5e and others)
    assert jnp.allclose(out_lanes, ref.T, atol=atol, rtol=rtol), \
        "mismatch vs reference (lane-major)"

    # Torch-style (N, K) wrapper keeps the original module's forward semantics.
    out_nk = jax.block_until_ready(
        trunk_forward(t, params, compute_dtype=compute_dtype))
    assert out_nk.shape == (N, K)
    assert jnp.allclose(out_nk, ref, atol=atol, rtol=rtol), \
        "mismatch vs reference (batch-major)"

    print("KERNEL_OK")
</pallas_src>

<mosaic_0001>
module attributes {stable_mosaic.version = 11 : i64} {
  func.func @trunk_kernel(%arg0: i32, %arg1: memref<1x4096xf32, #tpu.memory_space<vmem>>, %arg2: memref<32x1xf32, #tpu.memory_space<vmem>>, %arg3: memref<32x1xf32, #tpu.memory_space<vmem>>, %arg4: memref<32x32xf32, #tpu.memory_space<vmem>>, %arg5: memref<32x1xf32, #tpu.memory_space<vmem>>, %arg6: memref<8x32xf32, #tpu.memory_space<vmem>>, %arg7: memref<8x1xf32, #tpu.memory_space<vmem>>, %arg8: memref<8x4096xf32, #tpu.memory_space<vmem>>) attributes {dimension_semantics = [#tpu.dimension_semantics<parallel>], iteration_bounds = array<i64: 1>, scalar_prefetch = 0 : i64, scratch_operands = 0 : i64, tpu.core_type = #tpu.core_type<tc>, window_params = [{transform_indices = @transform_0, window_bounds = array<i64: 1, 4096>}, {pipeline_mode = #tpu.pipeline_mode<synchronous>, transform_indices = @transform_1, window_bounds = array<i64: 32, 1>}, {pipeline_mode = #tpu.pipeline_mode<synchronous>, transform_indices = @transform_2, window_bounds = array<i64: 32, 1>}, {pipeline_mode = #tpu.pipeline_mode<synchronous>, transform_indices = @transform_3, window_bounds = array<i64: 32, 32>}, {pipeline_mode = #tpu.pipeline_mode<synchronous>, transform_indices = @transform_4, window_bounds = array<i64: 32, 1>}, {pipeline_mode = #tpu.pipeline_mode<synchronous>, transform_indices = @transform_5, window_bounds = array<i64: 8, 32>}, {pipeline_mode = #tpu.pipeline_mode<synchronous>, transform_indices = @transform_6, window_bounds = array<i64: 8, 1>}, {transform_indices = @transform_7, window_bounds = array<i64: 8, 4096>}]} {
    %c0 = arith.constant 0 : index
    %c0_0 = arith.constant 0 : index
    %0 = vector.load %arg1[%c0, %c0_0] : memref<1x4096xf32, #tpu.memory_space<vmem>>, vector<1x4096xf32>
    %c0_1 = arith.constant 0 : index
    %c0_2 = arith.constant 0 : index
    %1 = vector.load %arg2[%c0_1, %c0_2] : memref<32x1xf32, #tpu.memory_space<vmem>>, vector<32x1xf32>
    %2 = vector.broadcast %1 : vector<32x1xf32> to vector<32x4096xf32>
    %3 = vector.broadcast %0 : vector<1x4096xf32> to vector<32x4096xf32>
    %4 = arith.mulf %2, %3 : vector<32x4096xf32>
    %c0_3 = arith.constant 0 : index
    %c0_4 = arith.constant 0 : index
    %5 = vector.load %arg3[%c0_3, %c0_4] : memref<32x1xf32, #tpu.memory_space<vmem>>, vector<32x1xf32>
    %6 = vector.broadcast %5 : vector<32x1xf32> to vector<32x4096xf32>
    %7 = arith.addf %4, %6 : vector<32x4096xf32>
    %8 = math.tanh %7 : vector<32x4096xf32>
    %c0_5 = arith.constant 0 : index
    %c0_6 = arith.constant 0 : index
    %9 = vector.load %arg4[%c0_5, %c0_6] : memref<32x32xf32, #tpu.memory_space<vmem>>, vector<32x32xf32>
    %cst = arith.constant dense<0.000000e+00> : vector<32x4096xf32>
    %10 = tpu.matmul %9, %8, %cst {dimension_numbers = #tpu.dot_dimension_numbers<[1], [0], [0], [1], [0, 0, 1, 1], [], []>} : vector<32x32xf32>, vector<32x4096xf32>, vector<32x4096xf32> -> vector<32x4096xf32>
    %c0_7 = arith.constant 0 : index
    %c0_8 = arith.constant 0 : index
    %11 = vector.load %arg5[%c0_7, %c0_8] : memref<32x1xf32, #tpu.memory_space<vmem>>, vector<32x1xf32>
    %12 = vector.broadcast %11 : vector<32x1xf32> to vector<32x4096xf32>
    %13 = arith.addf %10, %12 : vector<32x4096xf32>
    %14 = math.tanh %13 : vector<32x4096xf32>
    %c0_9 = arith.constant 0 : index
    %c0_10 = arith.constant 0 : index
    %15 = vector.load %arg6[%c0_9, %c0_10] : memref<8x32xf32, #tpu.memory_space<vmem>>, vector<8x32xf32>
    %cst_11 = arith.constant dense<0.000000e+00> : vector<8x4096xf32>
    %16 = tpu.matmul %15, %14, %cst_11 {dimension_numbers = #tpu.dot_dimension_numbers<[1], [0], [0], [1], [0, 0, 1, 1], [], []>} : vector<8x32xf32>, vector<32x4096xf32>, vector<8x4096xf32> -> vector<8x4096xf32>
    %c0_12 = arith.constant 0 : index
    %c0_13 = arith.constant 0 : index
    %17 = vector.load %arg7[%c0_12, %c0_13] : memref<8x1xf32, #tpu.memory_space<vmem>>, vector<8x1xf32>
    %18 = vector.broadcast %17 : vector<8x1xf32> to vector<8x4096xf32>
    %19 = arith.addf %16, %18 : vector<8x4096xf32>
    %c0_14 = arith.constant 0 : index
    %c0_15 = arith.constant 0 : index
    %20 = vector.load %arg8[%c0_14, %c0_15] : memref<8x4096xf32, #tpu.memory_space<vmem>>, vector<8x4096xf32>
    tpu.vector_store %arg8[%c0_14, %c0_15], %19 {strides = array<i32>} : memref<8x4096xf32, #tpu.memory_space<vmem>>, vector<8x4096xf32>,
    return
  }
  func.func @transform_0(%arg0: i32) -> (i32, i32) {
    %c0_i32 = arith.constant 0 : i32
    %c0_i32_0 = arith.constant 0 : i32
    return %c0_i32, %arg0 : i32, i32
  }
  func.func @transform_1(%arg0: i32) -> (i32, i32) {
    %c0_i32 = arith.constant 0 : i32
    %c0_i32_0 = arith.constant 0 : i32
    %c0_i32_1 = arith.constant 0 : i32
    return %c0_i32, %c0_i32_0 : i32, i32
  }
  func.func @transform_2(%arg0: i32) -> (i32, i32) {
    %c0_i32 = arith.constant 0 : i32
    %c0_i32_0 = arith.constant 0 : i32
    %c0_i32_1 = arith.constant 0 : i32
    return %c0_i32, %c0_i32_0 : i32, i32
  }
  func.func @transform_3(%arg0: i32) -> (i32, i32) {
    %c0_i32 = arith.constant 0 : i32
    %c0_i32_0 = arith.constant 0 : i32
    %c0_i32_1 = arith.constant 0 : i32
    return %c0_i32, %c0_i32_0 : i32, i32
  }
  func.func @transform_4(%arg0: i32) -> (i32, i32) {
    %c0_i32 = arith.constant 0 : i32
    %c0_i32_0 = arith.constant 0 : i32
    %c0_i32_1 = arith.constant 0 : i32
    return %c0_i32, %c0_i32_0 : i32, i32
  }
  func.func @transform_5(%arg0: i32) -> (i32, i32) {
    %c0_i32 = arith.constant 0 : i32
    %c0_i32_0 = arith.constant 0 : i32
    %c0_i32_1 = arith.constant 0 : i32
    return %c0_i32, %c0_i32_0 : i32, i32
  }
  func.func @transform_6(%arg0: i32) -> (i32, i32) {
    %c0_i32 = arith.constant 0 : i32
    %c0_i32_0 = arith.constant 0 : i32
    %c0_i32_1 = arith.constant 0 : i32
    return %c0_i32, %c0_i32_0 : i32, i32
  }
  func.func @transform_7(%arg0: i32) -> (i32, i32) {
    %c0_i32 = arith.constant 0 : i32
    %c0_i32_0 = arith.constant 0 : i32
    return %c0_i32, %arg0 : i32, i32
  }
}

</mosaic_0001>

<bundles_post_ra>
// kernel: tpu_custom_call.1
= control target key start
LH: loop header
LB: loop body
LE: loop exit
PB: predicated region body
PF: predicated region fallthrough
CT: control target
= control target key end

     0   :  { %v4294_v2 = vmov 0   ;;  %s5382_s0 = inlined_call_operand.vmem [shape: f32[1,4096], index: 0, kind: input, shape index: {}]   ;;  %s5383_s1 = inlined_call_operand.vmem [shape: f32[32,1], index: 1, kind: input, shape index: {}]   ;;  %s5384_s2 = inlined_call_operand.vmem [shape: f32[32,1], index: 2, kind: input, shape index: {}]   ;;  %s5385_s3 = inlined_call_operand.vmem [shape: f32[32,32], index: 3, kind: input, shape index: {}]   ;;  %s5386_s4 = inlined_call_operand.vmem [shape: f32[32,1], index: 4, kind: input, shape index: {}]   ;;  %s5387_s5 = inlined_call_operand.vmem [shape: f32[8,32], index: 5, kind: input, shape index: {}]   ;;  %s5388_s6 = inlined_call_operand.vmem [shape: f32[8,1], index: 6, kind: input, shape index: {}]   ;;  %s5389_s7 = inlined_call_operand.hbm [shape: f32[8,4096], index: 7, kind: output, shape index: {}]  }
   0x1   :  { %v347_v0 = vld [vmem:[%s5384_s2] sm:$0xff]  ;;  %3752 = vset.pattern.permute.xlu1 %v4294_v2  ;;  %3751 = vset.pattern.permute.xlu0 %v4294_v2  ;;  %v348_v3 = vld [vmem:[%s5384_s2 + $0x8] sm:$0xff] }
   0x2   :  { %v31_v1 = vld [vmem:[%s5383_s1] sm:$0xff]  ;;  %353 = vperm.xlu1 %3752, %v347_v0   ;;  %v32_v4 = vld [vmem:[%s5383_s1 + $0x8] sm:$0xff] }
   0x3   :  { %37 = vperm.xlu0 %3751, %v31_v1  }
   0x4   :  { %12 = vsyncpa [#allocation3], 0  ;;  %v34_v5 = vld [vmem:[%s5383_s1 + $0x18] sm:$0xff]  ;;  %v33_v6 = vld [vmem:[%s5383_s1 + $0x10] sm:$0xff]  ;;  %v4295_v14 = vmov 0.0   ;;  %v59_v15 = vlaneseq  ;;  %vm655_vm0 = vcmask 261120  }
   0x5   :  { %v350_v7 = vld [vmem:[%s5384_s2 + $0x18] sm:$0xff]  ;;  %v349_v8 = vld [vmem:[%s5384_s2 + $0x10] sm:$0xff]  ;;  %v632_v9 = vld [vmem:[%s5386_s4 + $0x8] sm:$0xff]  ;;  %732 = vmatprep.mubr.f32.mxu0 %v4295_v14  ;;  %821 = vmatprep.mubr.f32.mxu1 %v4295_v14 }
   0x6   :  { %358 = vperm.xlu1 %3752, %v348_v3   ;;  %v631_v10 = vld [vmem:[%s5386_s4] sm:$0xff]  ;;  %v634_v11 = vld [vmem:[%s5386_s4 + $0x18] sm:$0xff]  ;;  %v633_v12 = vld [vmem:[%s5386_s4 + $0x10] sm:$0xff]  ;;  %v60_v16 = vshrl.u32 %v59_v15, 7 }
   0x7   :  { %42 = vperm.xlu0 %3751, %v32_v4   ;;  %v2221_v13 = vld [vmem:[%s5388_s6] sm:$0xff] }
   0x8   :  { %v4378_v17 = vsub.s32 1, %v60_v16  ;;  %v4380_v18 = vsub.s32 3, %v60_v16  ;;  %v4382_v19 = vsub.s32 0, %v60_v16  ;;  %v4384_v20 = vsub.s32 2, %v60_v16  ;;  %v4389_v21 = vld [vmem:[%s5382_s0] sm:$0xff] }
   0x9   :  { %v4419_v42 = vsub.s32 5, %v60_v16  ;;  %v4429_v49 = vsub.s32 7, %v60_v16  ;;  %v4435_v51 = vsub.s32 4, %v60_v16  ;;  %v4449_v59 = vsub.s32 6, %v60_v16 }
   0xa   :  { %52 = vperm.xlu1 %3752, %v34_v5   ;;  %v66_v22 = vrot.slane %v4389_v21, %v4378_v17  ;;  %v74_v23 = vrot.slane %v4389_v21, %v4380_v18  ;;  %v62_v24 = vrot.slane %v4389_v21, %v4382_v19  ;;  %v70_v25 = vrot.slane %v4389_v21, %v4384_v20 }
   0xb   :  { %47 = vperm.xlu0 %3751, %v33_v6   ;;  %v4433_v50 = vrot.slane %v4389_v21, %v4419_v42  ;;  %v4447_v58 = vrot.slane %v4389_v21, %v4429_v49  ;;  %v4459_v2 = vrot.slane %v4389_v21, %v4435_v51  ;;  %v4474_v15 = vrot.slane %v4389_v21, %v4449_v59 }
   0xe   :  { %368 = vperm.xlu1 %3752, %v350_v7  }
   0xf   :  { %363 = vperm.xlu0 %3751, %v349_v8  }
  0x12   :  { %642 = vperm.xlu1 %3752, %v632_v9  }
  0x13   :  { %637 = vperm.xlu0 %3751, %v631_v10  }
  0x16   :  { %652 = vperm.xlu1 %3752, %v634_v11  }
  0x17   :  { %647 = vperm.xlu0 %3751, %v633_v12  }
  0x1b   :  { %2224 = vperm.xlu0 %3751, %v2221_v13  }
  0x81   :  { %v4399_v26 = vpop.permute.xlu1 %353 }
  0x82   :  { %v4401_v27 = vpop.permute.xlu0 %37 }
  0x83   :  { %v220_v28 = vmul.f32 %v66_v22, %v4401_v27  ;;  %v222_v29 = vmul.f32 %v74_v23, %v4401_v27  ;;  %v219_v30 = vmul.f32 %v62_v24, %v4401_v27  ;;  %v221_v31 = vmul.f32 %v70_v25, %v4401_v27 }
  0x84   :  { %v224_v6 = vmul.f32 %v4433_v50, %v4401_v27  ;;  %v226_v13 = vmul.f32 %v4447_v58, %v4401_v27 }
  0x85   :  { %v372_v32 = vadd.f32 %v4399_v26, %v220_v28  ;;  %v374_v33 = vadd.f32 %v4399_v26, %v222_v29  ;;  %v371_v34 = vadd.f32 %v4399_v26, %v219_v30  ;;  %v4410_v35 = vpop.permute.xlu1 %358  ;;  %v373_v37 = vadd.f32 %v4399_v26, %v221_v31 }
  0x86   :  { %v4412_v36 = vpop.permute.xlu0 %42  ;;  %v223_v28 = vmul.f32 %v4459_v2, %v4401_v27 }
  0x87   :  { %v252_v38 = vmul.f32 %v66_v22, %v4412_v36  ;;  %3753 = vtanh.f32 %v372_v32  ;;  %v254_v39 = vmul.f32 %v74_v23, %v4412_v36  ;;  %v251_v40 = vmul.f32 %v62_v24, %v4412_v36 }
  0x88   :  { %3755 = vtanh.f32 %v374_v33  ;;  %v253_v41 = vmul.f32 %v70_v25, %v4412_v36  ;;  %v256_v10 = vmul.f32 %v4433_v50, %v4412_v36  ;;  %v255_v31 = vmul.f32 %v4459_v2, %v4412_v36 }
  0x89   :  { %v404_v43 = vadd.f32 %v4410_v35, %v252_v38  ;;  %v406_v44 = vadd.f32 %v4410_v35, %v254_v39  ;;  %v403_v45 = vadd.f32 %v4410_v35, %v251_v40  ;;  %3757 = vtanh.f32 %v371_v34  ;;  %v4424_v46 = vpop.permute.xlu1 %52  ;;  %v4491_v38 = vld [vmem:[%s5382_s0 + $0x8] sm:$0xff] }
  0x8a   :  { %v4426_v47 = vpop.permute.xlu0 %47  ;;  %v405_v48 = vadd.f32 %v4410_v35, %v253_v41  ;;  %3759 = vtanh.f32 %v373_v37  ;;  %v316_v53 = vmul.f32 %v66_v22, %v4424_v46  ;;  %v318_v57 = vmul.f32 %v74_v23, %v4424_v46 }
  0x8b   :  { %3761 = vtanh.f32 %v404_v43  ;;  %v284_v52 = vmul.f32 %v66_v22, %v4426_v47  ;;  %v286_v54 = vmul.f32 %v74_v23, %v4426_v47  ;;  %v283_v63 = vmul.f32 %v62_v24, %v4426_v47 }
  0x8c   :  { %3763 = vtanh.f32 %v406_v44  ;;  %v315_v1 = vmul.f32 %v62_v24, %v4424_v46  ;;  %v285_v5 = vmul.f32 %v70_v25, %v4426_v47  ;;  %v317_v9 = vmul.f32 %v70_v25, %v4424_v46 }
  0x8d   :  { %3765 = vtanh.f32 %v403_v45  ;;  %v4440_v55 = vpop.permute.xlu1 %368  ;;  %v258_v23 = vmul.f32 %v4447_v58, %v4412_v36  ;;  %v376_v25 = vadd.f32 %v4399_v26, %v224_v6  ;;  %v408_v21 = vadd.f32 %v4410_v35, %v256_v10 }
  0x8e   :  { %v4442_v56 = vpop.permute.xlu0 %363  ;;  %3767 = vtanh.f32 %v405_v48  ;;  %v468_v61 = vadd.f32 %v4440_v55, %v316_v53  ;;  %v470_v0 = vadd.f32 %v4440_v55, %v318_v57  ;;  %v467_v8 = vadd.f32 %v4440_v55, %v315_v1 }
  0x8f   :  { %v436_v60 = vadd.f32 %v4442_v56, %v284_v52  ;;  %v438_v62 = vadd.f32 %v4442_v56, %v286_v54  ;;  %v435_v4 = vadd.f32 %v4442_v56, %v283_v63  ;;  %v437_v12 = vadd.f32 %v4442_v56, %v285_v5 }
  0x90   :  { %v469_v22 = vadd.f32 %v4440_v55, %v317_v9  ;;  %v378_v34 = vadd.f32 %v4399_v26, %v226_v13  ;;  %v225_v37 = vmul.f32 %v4474_v15, %v4401_v27  ;;  %v410_v41 = vadd.f32 %v4410_v35, %v258_v23 }
  0x91   :  { %v3754_v3 = vpop.eup %3753  ;;  %3769 = vtanh.f32 %v436_v60  ;;  %v257_v43 = vmul.f32 %v4474_v15, %v4412_v36  ;;  %v375_v45 = vadd.f32 %v4399_v26, %v223_v28  ;;  %v407_v48 = vadd.f32 %v4410_v35, %v255_v31 }
  0x92   :  { %v3756_v7 = vpop.eup %3755  ;;  %3771 = vtanh.f32 %v468_v61  ;;  %v4500_v52 = vrot.slane %v4491_v38, %v4378_v17  ;;  %v4504_v53 = vrot.slane %v4491_v38, %v4380_v18  ;;  %v377_v57 = vadd.f32 %v4399_v26, %v225_v37 }
  0x93   :  { %v3758_v11 = vpop.eup %3757  ;;  %3773 = vtanh.f32 %v438_v62  ;;  %v288_v60 = vmul.f32 %v4433_v50, %v4426_v47  ;;  %v4511_v61 = vrot.slane %v4491_v38, %v4382_v19  ;;  %v409_v63 = vadd.f32 %v4410_v35, %v257_v43 }
  0x94   :  { %v3760_v16 = vpop.eup %3759  ;;  %3775 = vtanh.f32 %v470_v0  ;;  %v320_v0 = vmul.f32 %v4433_v50, %v4424_v46  ;;  %v4518_v1 = vrot.slane %v4491_v38, %v4384_v20  ;;  %v290_v6 = vmul.f32 %v4447_v58, %v4426_v47 }
  0x95   :  { %v3762_v24 = vpop.eup %3761  ;;  %3777 = vtanh.f32 %v435_v4  ;;  %v440_v5 = vadd.f32 %v4442_v56, %v288_v60  ;;  %v322_v50 = vmul.f32 %v4447_v58, %v4424_v46  ;;  %v289_v23 = vmul.f32 %v4474_v15, %v4426_v47 }
  0x96   :  { %v3764_v29 = vpop.eup %3763  ;;  %v3492_v30 = vpack.c.bf16 %v3762_v24, %v3754_v3  ;;  %3779 = vtanh.f32 %v467_v8  ;;  %v472_v8 = vadd.f32 %v4440_v55, %v320_v0  ;;  %v228_v28 = vmul.f32 %v4500_v52, %v4401_v27 }
  0x97   :  { %v3766_v32 = vpop.eup %3765  ;;  %v3500_v33 = vpack.c.bf16 %v3764_v29, %v3756_v7  ;;  %3781 = vtanh.f32 %v437_v12  ;;  %v287_v12 = vmul.f32 %v4459_v2, %v4426_v47  ;;  %v230_v37 = vmul.f32 %v4504_v53, %v4401_v27 }
  0x98   :  { %v3768_v39 = vpop.eup %3767  ;;  %3493 = vmatprep.subr.bf16.mxu0 %v3492_v30  ;;  %v3494_v40 = vpack.c.bf16 %v3766_v32, %v3758_v11  ;;  %3783 = vtanh.f32 %v469_v22  ;;  %v442_v11 = vadd.f32 %v4442_v56, %v290_v6  ;;  %v319_v22 = vmul.f32 %v4459_v2, %v4424_v46 }
  0x99   :  { %3501 = vmatprep.subr.bf16.mxu1 %v3500_v33  ;;  %v3502_v44 = vpack.c.bf16 %v3768_v39, %v3760_v16  ;;  %3785 = vtanh.f32 %v376_v25  ;;  %v474_v16 = vadd.f32 %v4440_v55, %v322_v50  ;;  %v439_v25 = vadd.f32 %v4442_v56, %v287_v12  ;;  %v4545_v33 = vld [vmem:[%s5385_s3] sm:$0xff] }
  0x9a   :  { %3495 = vmatpush1.bf16.msra.mxu0 %v3494_v40  ;;  %3787 = vtanh.f32 %v408_v21  ;;  %v471_v30 = vadd.f32 %v4440_v55, %v319_v22  ;;  %v321_v21 = vmul.f32 %v4474_v15, %v4424_v46  ;;  %v260_v2 = vmul.f32 %v4500_v52, %v4412_v36  ;;  %v4592_v22 = vld [vmem:[%s5385_s3 + $0x10] sm:$0xff] }
  0x9b   :  { %v3770_v54 = vpop.eup %3769  ;;  %3503 = vmatpush1.bf16.msra.mxu1 %v3502_v44  ;;  %3789 = vtanh.f32 %v378_v34  ;;  %v441_v34 = vadd.f32 %v4442_v56, %v289_v23  ;;  %v262_v40 = vmul.f32 %v4504_v53, %v4412_v36  ;;  %v380_v44 = vadd.f32 %v4399_v26, %v228_v28 }
  0x9c   :  { %v3772_v62 = vpop.eup %3771  ;;  %3791 = vtanh.f32 %v410_v41  ;;  %v473_v15 = vadd.f32 %v4440_v55, %v321_v21  ;;  %v382_v0 = vadd.f32 %v4399_v26, %v230_v37  ;;  %v261_v6 = vmul.f32 %v4518_v1, %v4412_v36 }
  0x9d   :  { %v3774_v3 = vpop.eup %3773  ;;  %v3496_v4 = vpack.c.bf16 %v3772_v62, %v3770_v54  ;;  %3793 = vtanh.f32 %v375_v45  ;;  %v227_v45 = vmul.f32 %v4511_v61, %v4401_v27  ;;  %v412_v54 = vadd.f32 %v4410_v35, %v260_v2 }
  0x9e   :  { %v3776_v7 = vpop.eup %3775  ;;  %3795 = vtanh.f32 %v407_v48  ;;  %v4586_v12 = vrot.slane %v4491_v38, %v4429_v49  ;;  %v324_v28 = vmul.f32 %v4500_v52, %v4424_v46  ;;  %v4617_v37 = vrot.slane %v4491_v38, %v4449_v59 }
  0x9f   :  { %v3778_v9 = vpop.eup %3777  ;;  %3497 = vmatprep.subr.bf16.mxu0 %v3496_v4  ;;  %v3504_v10 = vpack.c.bf16 %v3776_v7, %v3774_v3  ;;  %3797 = vtanh.f32 %v377_v57  ;;  %v259_v57 = vmul.f32 %v4511_v61, %v4412_v36  ;;  %v229_v3 = vmul.f32 %v4518_v1, %v4401_v27 }
  0xa0   :  { %v3780_v13 = vpop.eup %3779  ;;  %3799 = vtanh.f32 %v409_v63  ;;  %v4565_v63 = vld [vmem:[%s5385_s3 + $0x8] sm:$0xff]  ;;  %v379_v50 = vadd.f32 %v4399_v26, %v227_v45  ;;  %v293_v45 = vmul.f32 %v4518_v1, %v4426_v47 }
  0xa1   :  { %v3782_v58 = vpop.eup %3781  ;;  %3505 = vmatprep.subr.bf16.mxu1 %v3504_v10  ;;  %v3498_v24 = vpack.c.bf16 %v3780_v13, %v3778_v9  ;;  %3801 = vtanh.f32 %v440_v5  ;;  %v414_v5 = vadd.f32 %v4410_v35, %v262_v40  ;;  %v411_v10 = vadd.f32 %v4410_v35, %v259_v57  ;;  %v4623_v40 = vld [vmem:[%s5385_s3 + $0x18] sm:$0xff] }
  0xa2   :  { %v3784_v29 = vpop.eup %3783  ;;  %3803 = vtanh.f32 %v472_v8  ;;  %v381_v23 = vadd.f32 %v4399_v26, %v229_v3 }
  0xa3   :  { %v3786_v31 = vpop.eup %3785  ;;  %3499 = vmatpush1.bf16.msra.mxu0 %v3498_v24  ;;  %v3506_v32 = vpack.c.bf16 %v3784_v29, %v3782_v58  ;;  %3805 = vtanh.f32 %v442_v11  ;;  %v4582_v11 = vrot.slane %v4491_v38, %v4419_v42  ;;  %v292_v58 = vmul.f32 %v4500_v52, %v4426_v47 }
  0xa4   :  { %v3788_v39 = vpop.eup %3787  ;;  %3807 = vtanh.f32 %v474_v16  ;;  %v4604_v29 = vrot.slane %v4491_v38, %v4435_v51  ;;  %v476_v52 = vadd.f32 %v4440_v55, %v324_v28 }
  0xa5   :  { %v3790_v41 = vpop.eup %3789  ;;  %3507 = vmatpush1.bf16.msra.mxu1 %v3506_v32  ;;  %v3508_v43 = vpack.c.bf16 %v3788_v39, %v3786_v31  ;;  %3809 = vtanh.f32 %v439_v25  ;;  %v413_v25 = vadd.f32 %v4410_v35, %v261_v6  ;;  %v444_v2 = vadd.f32 %v4442_v56, %v292_v58 }
  0xa6   :  { %v3792_v48 = vpop.eup %3791  ;;  %3412 = vmatmul.mubr.msk.f32.vlgmr.msra.gmra.mrb[0].mxu0 %vm655_vm0, %v4545_v33  ;;  %3811 = vtanh.f32 %v471_v30  ;;  %v294_v31 = vmul.f32 %v4504_v53, %v4426_v47  ;;  %v264_v3 = vmul.f32 %v4582_v11, %v4412_v36  ;;  %v445_v6 = vadd.f32 %v4442_v56, %v293_v45 }
  0xa7   :  { %v3794_v60 = vpop.eup %3793  ;;  %3509 = vmatprep.subr.bf16.mxu0 %v3508_v43  ;;  %v3516_v62 = vpack.c.bf16 %v3792_v48, %v3790_v41  ;;  %738 = vmatprep.mubr.f32.mxu0 %v4295_v14  ;;  %3813 = vtanh.f32 %v441_v34  ;;  %v326_v34 = vmul.f32 %v4504_v53, %v4424_v46  ;;  %v291_v53 = vmul.f32 %v4511_v61, %v4426_v47 }
  0xa8   :  { %v3796_v4 = vpop.eup %3795  ;;  %3416 = vmatmul.mubr.msk.f32.vlgmr.msra.gmra.mrb[0].mxu1 %vm655_vm0, %v4545_v33  ;;  %3815 = vtanh.f32 %v473_v15  ;;  %v446_v41 = vadd.f32 %v4442_v56, %v294_v31  ;;  %v416_v58 = vadd.f32 %v4410_v35, %v264_v3 }
  0xa9   :  { %v3798_v7 = vpop.eup %3797  ;;  %3517 = vmatprep.subr.bf16.mxu1 %v3516_v62  ;;  %v3510_v8 = vpack.c.bf16 %v3796_v4, %v3794_v60  ;;  %827 = vmatprep.mubr.f32.mxu1 %v4295_v14  ;;  %3817 = vtanh.f32 %v380_v44  ;;  %v478_v38 = vadd.f32 %v4440_v55, %v326_v34  ;;  %v323_v44 = vmul.f32 %v4511_v61, %v4424_v46 }
  0xaa   :  { %v3800_v9 = vpop.eup %3799  ;;  %3413 = vmatmul.mubr.msk.f32.gmra.mrb[2].mxu0 %vm655_vm0, %v4565_v63  ;;  %3819 = vtanh.f32 %v412_v54  ;;  %v443_v57 = vadd.f32 %v4442_v56, %v291_v53  ;;  %v232_v60 = vmul.f32 %v4582_v11, %v4401_v27 }
  0xab   :  { %v3802_v13 = vpop.eup %3801  ;;  %3511 = vmatpush1.bf16.msra.mxu0 %v3510_v8  ;;  %v3518_v16 = vpack.c.bf16 %v3800_v9, %v3798_v7  ;;  %3821 = vtanh.f32 %v382_v0  ;;  %744 = vmatprep.mubr.f32.mxu0 %v4295_v14  ;;  %v475_v61 = vadd.f32 %v4440_v55, %v323_v44  ;;  %v325_v0 = vmul.f32 %v4518_v1, %v4424_v46 }
  0xac   :  { %v3804_v24 = vpop.eup %3803  ;;  %3417 = vmatmul.mubr.msk.f32.gmra.mrb[2].mxu1 %vm655_vm0, %v4565_v63  ;;  %3823 = vtanh.f32 %v414_v5  ;;  %v234_v7 = vmul.f32 %v4586_v12, %v4401_v27 }
  0xad   :  { %v3806_v30 = vpop.eup %3805  ;;  %3519 = vmatpush1.bf16.msra.mxu1 %v3518_v16  ;;  %v3512_v21 = vpack.c.bf16 %v3804_v24, %v3802_v13  ;;  %833 = vmatprep.mubr.f32.mxu1 %v4295_v14  ;;  %3825 = vtanh.f32 %v379_v50  ;;  %v477_v1 = vadd.f32 %v4440_v55, %v325_v0  ;;  %v266_v50 = vmul.f32 %v4586_v12, %v4412_v36 }
  0xae   :  { %v3808_v32 = vpop.eup %3807  ;;  %3414 = vmatmul.mubr.msk.f32.gmra.mrb[4].mxu0 %vm655_vm0, %v4592_v22  ;;  %3827 = vtanh.f32 %v411_v10  ;;  %v384_v13 = vadd.f32 %v4399_v26, %v232_v60  ;;  %v231_v16 = vmul.f32 %v4604_v29, %v4401_v27  ;;  %v263_v24 = vmul.f32 %v4604_v29, %v4412_v36 }
  0xaf   :  { %v3810_v39 = vpop.eup %3809  ;;  %3513 = vmatprep.subr.bf16.mxu0 %v3512_v21  ;;  %v3520_v15 = vpack.c.bf16 %v3808_v32, %v3806_v30  ;;  %750 = vmatprep.mubr.f32.mxu0 %v4295_v14  ;;  %3829 = vtanh.f32 %v381_v23  ;;  %v386_v30 = vadd.f32 %v4399_v26, %v234_v7  ;;  %v233_v21 = vmul.f32 %v4617_v37, %v4401_v27 }
  0xb0   :  { %v3812_v43 = vpop.eup %3811  ;;  %3418 = vmatmul.mubr.msk.f32.gmra.mrb[4].mxu1 %vm655_vm0, %v4592_v22  ;;  %3831 = vtanh.f32 %v413_v25  ;;  %v418_v32 = vadd.f32 %v4410_v35, %v266_v50  ;;  %v415_v53 = vadd.f32 %v4410_v35, %v263_v24  ;;  %v330_v7 = vmul.f32 %v4586_v12, %v4424_v46 }
  0xb1   :  { %v3814_v48 = vpop.eup %3813  ;;  %3521 = vmatprep.subr.bf16.mxu1 %v3520_v15  ;;  %v3514_v54 = vpack.c.bf16 %v3812_v43, %v3810_v39  ;;  %839 = vmatprep.mubr.f32.mxu1 %v4295_v14  ;;  %3833 = vtanh.f32 %v444_v2  ;;  %v4671_v2 = vld [vmem:[%s5382_s0 + $0x10] sm:$0xff]  ;;  %v383_v15 = vadd.f32 %v4399_v26, %v231_v16  ;;  %v327_v16 = vmul.f32 %v4604_v29, %v4424_v46 }
  0xb2   :  { %v3816_v62 = vpop.eup %3815  ;;  %3415 = vmatmul.mubr.msk.f32.gmra.mrb[6].mxu0 %vm655_vm0, %v4623_v40  ;;  %3835 = vtanh.f32 %v476_v52  ;;  %v265_v52 = vmul.f32 %v4617_v37, %v4412_v36  ;;  %v4685_v43 = vrot.slane %v4671_v2, %v4378_v17 }
  0xb3   :  { %v3818_v4 = vpop.eup %3817  ;;  %3515 = vmatpush1.bf16.msra.mxu0 %v3514_v54  ;;  %v3522_v5 = vpack.c.bf16 %v3816_v62, %v3814_v48  ;;  %910 = vmatprep.mubr.f32.mxu0 %v4295_v14  ;;  %3837 = vtanh.f32 %v446_v41  ;;  %v385_v48 = vadd.f32 %v4399_v26, %v233_v21  ;;  %v296_v54 = vmul.f32 %v4582_v11, %v4426_v47 }
  0xb4   :  { %v3820_v8 = vpop.eup %3819  ;;  %3419 = vmatmul.mubr.msk.f32.gmra.mrb[6].mxu1 %vm655_vm0, %v4623_v40  ;;  %3839 = vtanh.f32 %v478_v38  ;;  %v4689_v38 = vrot.slane %v4671_v2, %v4380_v18  ;;  %v417_v60 = vadd.f32 %v4410_v35, %v265_v52  ;;  %v328_v62 = vmul.f32 %v4582_v11, %v4424_v46 }
  0xb5   :  { %v3822_v9 = vpop.eup %3821  ;;  %3523 = vmatpush1.bf16.msra.mxu1 %v3522_v5  ;;  %v3524_v10 = vpack.c.bf16 %v3820_v8, %v3818_v4  ;;  %999 = vmatprep.mubr.f32.mxu1 %v4295_v14  ;;  %3841 = vtanh.f32 %v443_v57  ;;  %v448_v4 = vadd.f32 %v4442_v56, %v296_v54  ;;  %v298_v5 = vmul.f32 %v4586_v12, %v4426_v47 }
  0xb6   :  { %v3824_v23 = vpop.eup %3823  ;;  %3420 = vmatmul.mubr.msk.f32.vlgmr.msra.gmra.mrb[8].mxu0 %vm655_vm0, %v4545_v33  ;;  %3843 = vtanh.f32 %v475_v61  ;;  %v4702_v61 = vrot.slane %v4671_v2, %v4382_v19  ;;  %v480_v11 = vadd.f32 %v4440_v55, %v328_v62  ;;  %v295_v8 = vmul.f32 %v4604_v29, %v4426_v47 }
  0xb7   :  { %v3826_v25 = vpop.eup %3825  ;;  %3525 = vmatprep.subr.bf16.mxu0 %v3524_v10  ;;  %v3532_v28 = vpack.c.bf16 %v3824_v23, %v3822_v9  ;;  %916 = vmatprep.mubr.f32.mxu0 %v4295_v14  ;;  %3845 = vtanh.f32 %v445_v6  ;;  %v450_v9 = vadd.f32 %v4442_v56, %v298_v5  ;;  %v4719_v10 = vrot.slane %v4671_v2, %v4384_v20 }
  0xb8   :  { %v3828_v31 = vpop.eup %3827  ;;  %3424 = vmatmul.mubr.msk.f32.vlgmr.msra.gmra.mrb[8].mxu1 %vm655_vm0, %v4545_v33  ;;  %3847 = vtanh.f32 %v477_v1  ;;  %v482_v12 = vadd.f32 %v4440_v55, %v330_v7  ;;  %v447_v23 = vadd.f32 %v4442_v56, %v295_v8  ;;  %v479_v29 = vadd.f32 %v4440_v55, %v327_v16 }
  0xb9   :  { %v3830_v34 = vpop.eup %3829  ;;  %3533 = vmatprep.subr.bf16.mxu1 %v3532_v28  ;;  %v3526_v39 = vpack.c.bf16 %v3828_v31, %v3826_v25  ;;  %1005 = vmatprep.mubr.f32.mxu1 %v4295_v14  ;;  %3849 = vtanh.f32 %v384_v13  ;;  %v297_v25 = vmul.f32 %v4617_v37, %v4426_v47  ;;  %v236_v28 = vmul.f32 %v4685_v43, %v4401_v27 }
  0xba   :  { %v3832_v41 = vpop.eup %3831  ;;  %3421 = vmatmul.mubr.msk.f32.gmra.mrb[10].mxu0 %vm655_vm0, %v4565_v63  ;;  %3851 = vtanh.f32 %v416_v58  ;;  %v329_v21 = vmul.f32 %v4617_v37, %v4424_v46  ;;  %v268_v31 = vmul.f32 %v4685_v43, %v4412_v36 }
  0xbb   :  { %v3834_v44 = vpop.eup %3833  ;;  %3527 = vmatpush1.bf16.msra.mxu0 %v3526_v39  ;;  %v3534_v45 = vpack.c.bf16 %v3832_v41, %v3830_v34  ;;  %3853 = vtanh.f32 %v386_v30  ;;  %922 = vmatprep.mubr.f32.mxu0 %v4295_v14  ;;  %v449_v34 = vadd.f32 %v4442_v56, %v297_v25  ;;  %v238_v39 = vmul.f32 %v4689_v38, %v4401_v27 }
  0xbc   :  { %v3836_v57 = vpop.eup %3835  ;;  %3425 = vmatmul.mubr.msk.f32.gmra.mrb[10].mxu1 %vm655_vm0, %v4565_v63  ;;  %3855 = vtanh.f32 %v418_v32  ;;  %v481_v37 = vadd.f32 %v4440_v55, %v329_v21  ;;  %v270_v41 = vmul.f32 %v4689_v38, %v4412_v36 }
  0xbd   :  { %v3838_v0 = vpop.eup %3837  ;;  %3535 = vmatpush1.bf16.msra.mxu1 %v3534_v45  ;;  %v3528_v3 = vpack.c.bf16 %v3836_v57, %v3834_v44  ;;  %1011 = vmatprep.mubr.f32.mxu1 %v4295_v14  ;;  %3857 = vtanh.f32 %v383_v15  ;;  %v388_v45 = vadd.f32 %v4399_v26, %v236_v28  ;;  %v420_v57 = vadd.f32 %v4410_v35, %v268_v31 }
  0xbe   :  { %v3840_v6 = vpop.eup %3839  ;;  %3422 = vmatmul.mubr.msk.f32.gmra.mrb[12].mxu0 %vm655_vm0, %v4592_v22  ;;  %3859 = vtanh.f32 %v415_v53 }
  0xbf   :  { %v3842_v1 = vpop.eup %3841  ;;  %3529 = vmatprep.subr.bf16.mxu0 %v3528_v3  ;;  %v3536_v50 = vpack.c.bf16 %v3840_v6, %v3838_v0  ;;  %928 = vmatprep.mubr.f32.mxu0 %v4295_v14  ;;  %3861 = vtanh.f32 %v385_v48  ;;  %v235_v48 = vmul.f32 %v4702_v61, %v4401_v27  ;;  %v390_v3 = vadd.f32 %v4399_v26, %v238_v39 }
  0xc0   :  { %v3844_v13 = vpop.eup %3843  ;;  %3426 = vmatmul.mubr.msk.f32.gmra.mrb[12].mxu1 %vm655_vm0, %v4592_v22  ;;  %3863 = vtanh.f32 %v417_v60  ;;  %v267_v60 = vmul.f32 %v4702_v61, %v4412_v36  ;;  %v422_v6 = vadd.f32 %v4410_v35, %v270_v41  ;;  %v334_v39 = vmul.f32 %v4689_v38, %v4424_v46 }
  0xc1   :  { %v3846_v58 = vpop.eup %3845  ;;  %3537 = vmatprep.subr.bf16.mxu1 %v3536_v50  ;;  %v3530_v24 = vpack.c.bf16 %v3844_v13, %v3842_v1  ;;  %1017 = vmatprep.mubr.f32.mxu1 %v4295_v14  ;;  %3865 = vtanh.f32 %v448_v4  ;;  %v237_v4 = vmul.f32 %v4719_v10, %v4401_v27  ;;  %v387_v1 = vadd.f32 %v4399_v26, %v235_v48 }
  0xc2   :  { %v3848_v30 = vpop.eup %3847  ;;  %3423 = vmatmul.mubr.msk.f32.gmra.mrb[14].mxu0 %vm655_vm0, %v4623_v40  ;;  %3867 = vtanh.f32 %v480_v11  ;;  %v269_v11 = vmul.f32 %v4719_v10, %v4412_v36  ;;  %v4773_v13 = vrot.slane %v4671_v2, %v4419_v42  ;;  %v331_v48 = vmul.f32 %v4702_v61, %v4424_v46 }
  0xc3   :  { %v3850_v32 = vpop.eup %3849  ;;  %3531 = vmatpush1.bf16.msra.mxu0 %v3530_v24  ;;  %v3538_v52 = vpack.c.bf16 %v3848_v30, %v3846_v58  ;;  %1088 = vmatprep.mubr.f32.mxu0 %v4295_v14  ;;  %3869 = vtanh.f32 %v450_v9  ;;  %v419_v9 = vadd.f32 %v4410_v35, %v267_v60  ;;  %v389_v58 = vadd.f32 %v4399_v26, %v237_v4 }
  0xc4   :  { %v3852_v15 = vpop.eup %3851  ;;  %3427 = vmatmul.mubr.msk.f32.gmra.mrb[14].mxu1 %vm655_vm0, %v4623_v40  ;;  %3871 = vtanh.f32 %v482_v12  ;;  %v4777_v12 = vrot.slane %v4671_v2, %v4429_v49  ;;  %v300_v24 = vmul.f32 %v4685_v43, %v4426_v47  ;;  %v421_v28 = vadd.f32 %v4410_v35, %v269_v11 }
  0xc5   :  { %v3854_v53 = vpop.eup %3853  ;;  %3539 = vmatpush1.bf16.msra.mxu1 %v3538_v52  ;;  %v3540_v44 = vpack.c.bf16 %v3852_v15, %v3850_v32  ;;  %1177 = vmatprep.mubr.f32.mxu1 %v4295_v14  ;;  %3873 = vtanh.f32 %v447_v23  ;;  %v332_v30 = vmul.f32 %v4685_v43, %v4424_v46  ;;  %v302_v52 = vmul.f32 %v4689_v38, %v4426_v47 }
  0xc6   :  { %v3856_v54 = vpop.eup %3855  ;;  %3428 = vmatmul.mubr.msk.f32.vlgmr.msra.gmra.mrb[16].mxu0 %vm655_vm0, %v4545_v33  ;;  %3875 = vtanh.f32 %v479_v29  ;;  %v4790_v29 = vrot.slane %v4671_v2, %v4435_v51  ;;  %v452_v32 = vadd.f32 %v4442_v56, %v300_v24  ;;  %v299_v15 = vmul.f32 %v4702_v61, %v4426_v47 }
  0xc7   :  { %v3858_v62 = vpop.eup %3857  ;;  %3541 = vmatprep.subr.bf16.mxu0 %v3540_v44  ;;  %v3548_v0 = vpack.c.bf16 %v3856_v54, %v3854_v53  ;;  %1094 = vmatprep.mubr.f32.mxu0 %v4295_v14  ;;  %3877 = vtanh.f32 %v449_v34  ;;  %v484_v43 = vadd.f32 %v4440_v55, %v332_v30  ;;  %v454_v53 = vadd.f32 %v4442_v56, %v302_v52 }
  0xc8   :  { %v3860_v5 = vpop.eup %3859  ;;  %3432 = vmatmul.mubr.msk.f32.vlgmr.msra.gmra.mrb[16].mxu1 %vm655_vm0, %v4545_v33  ;;  %3879 = vtanh.f32 %v481_v37  ;;  %v4807_v44 = vrot.slane %v4671_v2, %v4449_v59  ;;  %v486_v38 = vadd.f32 %v4440_v55, %v334_v39  ;;  %v451_v54 = vadd.f32 %v4442_v56, %v299_v15 }
  0xc9   :  { %v3862_v7 = vpop.eup %3861  ;;  %3549 = vmatprep.subr.bf16.mxu1 %v3548_v0  ;;  %v3542_v8 = vpack.c.bf16 %v3860_v5, %v3858_v62  ;;  %1183 = vmatprep.mubr.f32.mxu1 %v4295_v14  ;;  %3881 = vtanh.f32 %v388_v45  ;;  %v301_v2 = vmul.f32 %v4719_v10, %v4426_v47  ;;  %v240_v62 = vmul.f32 %v4773_v13, %v4401_v27 }
  0xca   :  { %v3864_v50 = vpop.eup %3863  ;;  %3429 = vmatmul.mubr.msk.f32.gmra.mrb[18].mxu0 %vm655_vm0, %v4565_v63  ;;  %3883 = vtanh.f32 %v420_v57  ;;  %v483_v61 = vadd.f32 %v4440_v55, %v331_v48  ;;  %v272_v4 = vmul.f32 %v4773_v13, %v4412_v36 }
  0xcb   :  { %v3866_v16 = vpop.eup %3865  ;;  %3543 = vmatpush1.bf16.msra.mxu0 %v3542_v8  ;;  %v3550_v23 = vpack.c.bf16 %v3864_v50, %v3862_v7  ;;  %3885 = vtanh.f32 %v390_v3  ;;  %1100 = vmatprep.mubr.f32.mxu0 %v4295_v14  ;;  %v333_v3 = vmul.f32 %v4719_v10, %v4424_v46  ;;  %v453_v11 = vadd.f32 %v4442_v56, %v301_v2 }
  0xcc   :  { %v3868_v25 = vpop.eup %3867  ;;  %3433 = vmatmul.mubr.msk.f32.gmra.mrb[18].mxu1 %vm655_vm0, %v4565_v63  ;;  %3887 = vtanh.f32 %v422_v6  ;;  %v242_v7 = vmul.f32 %v4777_v12, %v4401_v27  ;;  %v424_v24 = vadd.f32 %v4410_v35, %v272_v4  ;;  %v306_v4 = vmul.f32 %v4777_v12, %v4426_v47 }
  0xcd   :  { %v3870_v21 = vpop.eup %3869  ;;  %3551 = vmatpush1.bf16.msra.mxu1 %v3550_v23  ;;  %v3544_v31 = vpack.c.bf16 %v3868_v25, %v3866_v16  ;;  %1189 = vmatprep.mubr.f32.mxu1 %v4295_v14  ;;  %3889 = vtanh.f32 %v387_v1  ;;  %v485_v10 = vadd.f32 %v4440_v55, %v333_v3  ;;  %v274_v1 = vmul.f32 %v4777_v12, %v4412_v36 }
  0xce   :  { %v3872_v34 = vpop.eup %3871  ;;  %3430 = vmatmul.mubr.msk.f32.gmra.mrb[20].mxu0 %vm655_vm0, %v4592_v22  ;;  %3891 = vtanh.f32 %v419_v9  ;;  %v392_v16 = vadd.f32 %v4399_v26, %v240_v62  ;;  %v239_v23 = vmul.f32 %v4790_v29, %v4401_v27  ;;  %v271_v25 = vmul.f32 %v4790_v29, %v4412_v36 }
  0xcf   :  { %v3874_v37 = vpop.eup %3873  ;;  %3545 = vmatprep.subr.bf16.mxu0 %v3544_v31  ;;  %v3552_v41 = vpack.c.bf16 %v3872_v34, %v3870_v21  ;;  %1106 = vmatprep.mubr.f32.mxu0 %v4295_v14  ;;  %3893 = vtanh.f32 %v389_v58  ;;  %v394_v21 = vadd.f32 %v4399_v26, %v242_v7  ;;  %v241_v31 = vmul.f32 %v4807_v44, %v4401_v27 }
  0xd0   :  { %v3876_v45 = vpop.eup %3875  ;;  %3434 = vmatmul.mubr.msk.f32.gmra.mrb[20].mxu1 %vm655_vm0, %v4592_v22  ;;  %3895 = vtanh.f32 %v421_v28  ;;  %v426_v34 = vadd.f32 %v4410_v35, %v274_v1 }
  0xd1   :  { %v3878_v57 = vpop.eup %3877  ;;  %3553 = vmatprep.subr.bf16.mxu1 %v3552_v41  ;;  %v3546_v60 = vpack.c.bf16 %v3876_v45, %v3874_v37  ;;  %1195 = vmatprep.mubr.f32.mxu1 %v4295_v14  ;;  %3897 = vtanh.f32 %v452_v32  ;;  %v4852_v32 = vld [vmem:[%s5382_s0 + $0x18] sm:$0xff]  ;;  %v391_v37 = vadd.f32 %v4399_v26, %v239_v23 }
  0xd2   :  { %v3880_v0 = vpop.eup %3879  ;;  %3431 = vmatmul.mubr.msk.f32.gmra.mrb[22].mxu0 %vm655_vm0, %v4623_v40  ;;  %3899 = vtanh.f32 %v484_v43  ;;  %v273_v43 = vmul.f32 %v4807_v44, %v4412_v36  ;;  %v4866_v45 = vrot.slane %v4852_v32, %v4378_v17  ;;  %v4883_v62 = vrot.slane %v4852_v32, %v4382_v19 }
  0xd3   :  { %v3882_v5 = vpop.eup %3881  ;;  %3547 = vmatpush1.bf16.msra.mxu0 %v3546_v60  ;;  %v3554_v6 = vpack.c.bf16 %v3880_v0, %v3878_v57  ;;  %1266 = vmatprep.mubr.f32.mxu0 %v4295_v14  ;;  %3901 = vtanh.f32 %v454_v53  ;;  %v423_v53 = vadd.f32 %v4410_v35, %v271_v25  ;;  %v393_v57 = vadd.f32 %v4399_v26, %v241_v31 }
  0xd4   :  { %v3884_v8 = vpop.eup %3883  ;;  %3435 = vmatmul.mubr.msk.f32.gmra.mrb[22].mxu1 %vm655_vm0, %v4623_v40  ;;  %3903 = vtanh.f32 %v486_v38  ;;  %v4870_v38 = vrot.slane %v4852_v32, %v4380_v18  ;;  %v304_v60 = vmul.f32 %v4773_v13, %v4426_v47  ;;  %v425_v17 = vadd.f32 %v4410_v35, %v273_v43 }
  0xd5   :  { %v3886_v50 = vpop.eup %3885  ;;  %3555 = vmatpush1.bf16.msra.mxu1 %v3554_v6  ;;  %v3556_v9 = vpack.c.bf16 %v3884_v8, %v3882_v5  ;;  %1355 = vmatprep.mubr.f32.mxu1 %v4295_v14  ;;  %3905 = vtanh.f32 %v451_v54  ;;  %v336_v18 = vmul.f32 %v4773_v13, %v4424_v46  ;;  %v338_v19 = vmul.f32 %v4777_v12, %v4424_v46 }
  0xd6   :  { %v3888_v58 = vpop.eup %3887  ;;  %3436 = vmatmul.mubr.msk.f32.vlgmr.msra.gmra.mrb[24].mxu0 %vm655_vm0, %v4545_v33  ;;  %3907 = vtanh.f32 %v483_v61  ;;  %v456_v3 = vadd.f32 %v4442_v56, %v304_v60  ;;  %v4896_v6 = vrot.slane %v4852_v32, %v4384_v20  ;;  %v458_v8 = vadd.f32 %v4442_v56, %v306_v4 }
  0xd7   :  { %v3890_v28 = vpop.eup %3889  ;;  %3557 = vmatprep.subr.bf16.mxu0 %v3556_v9  ;;  %v3564_v30 = vpack.c.bf16 %v3888_v58, %v3886_v50  ;;  %1272 = vmatprep.mubr.f32.mxu0 %v4295_v14  ;;  %3909 = vtanh.f32 %v453_v11  ;;  %v488_v13 = vadd.f32 %v4440_v55, %v336_v18  ;;  %v490_v12 = vadd.f32 %v4440_v55, %v338_v19 }
  0xd8   :  { %v3892_v52 = vpop.eup %3891  ;;  %3440 = vmatmul.mubr.msk.f32.vlgmr.msra.gmra.mrb[24].mxu1 %vm655_vm0, %v4545_v33  ;;  %3911 = vtanh.f32 %v485_v10  ;;  %v303_v10 = vmul.f32 %v4790_v29, %v4426_v47  ;;  %v335_v20 = vmul.f32 %v4790_v29, %v4424_v46  ;;  %v305_v50 = vmul.f32 %v4807_v44, %v4426_v47 }
  0xd9   :  { %v3894_v39 = vpop.eup %3893  ;;  %3565 = vmatprep.subr.bf16.mxu1 %v3564_v30  ;;  %v3558_v15 = vpack.c.bf16 %v3892_v52, %v3890_v28  ;;  %1361 = vmatprep.mubr.f32.mxu1 %v4295_v14  ;;  %3913 = vtanh.f32 %v392_v16  ;;  %v244_v58 = vmul.f32 %v4866_v45, %v4401_v27  ;;  %v337_v25 = vmul.f32 %v4807_v44, %v4424_v46 }
  0xda   :  { %v3896_v41 = vpop.eup %3895  ;;  %3437 = vmatmul.mubr.msk.f32.gmra.mrb[26].mxu0 %vm655_vm0, %v4565_v63  ;;  %3915 = vtanh.f32 %v424_v24  ;;  %v455_v23 = vadd.f32 %v4442_v56, %v303_v10  ;;  %v487_v29 = vadd.f32 %v4440_v55, %v335_v20  ;;  %v276_v28 = vmul.f32 %v4866_v45, %v4412_v36 }
  0xdb   :  { %v3898_v48 = vpop.eup %3897  ;;  %3559 = vmatpush1.bf16.msra.mxu0 %v3558_v15  ;;  %v3566_v54 = vpack.c.bf16 %v3896_v41, %v3894_v39  ;;  %3917 = vtanh.f32 %v394_v21  ;;  %1278 = vmatprep.mubr.f32.mxu0 %v4295_v14  ;;  %v457_v31 = vadd.f32 %v4442_v56, %v305_v50  ;;  %v246_v52 = vmul.f32 %v4870_v38, %v4401_v27 }
  0xdc   :  { %v3900_v2 = vpop.eup %3899  ;;  %3441 = vmatmul.mubr.msk.f32.gmra.mrb[26].mxu1 %vm655_vm0, %v4565_v63  ;;  %3919 = vtanh.f32 %v426_v34  ;;  %v489_v44 = vadd.f32 %v4440_v55, %v337_v25  ;;  %v278_v43 = vmul.f32 %v4870_v38, %v4412_v36  ;;  %v243_v41 = vmul.f32 %v4883_v62, %v4401_v27 }
  0xdd   :  { %v3902_v0 = vpop.eup %3901  ;;  %3567 = vmatpush1.bf16.msra.mxu1 %v3566_v54  ;;  %v3560_v61 = vpack.c.bf16 %v3900_v2, %v3898_v48  ;;  %1367 = vmatprep.mubr.f32.mxu1 %v4295_v14  ;;  %3921 = vtanh.f32 %v391_v37  ;;  %v396_v37 = vadd.f32 %v4399_v26, %v244_v58  ;;  %v428_v48 = vadd.f32 %v4410_v35, %v276_v28 }
  0xde   :  { %v3904_v5 = vpop.eup %3903  ;;  %3438 = vmatmul.mubr.msk.f32.gmra.mrb[28].mxu0 %vm655_vm0, %v4592_v22  ;;  %3923 = vtanh.f32 %v423_v53  ;;  %v275_v54 = vmul.f32 %v4883_v62, %v4412_v36  ;;  %v398_v2 = vadd.f32 %v4399_v26, %v246_v52  ;;  %v4954_v19 = vrot.slane %v4852_v32, %v4419_v42 }
  0xdf   :  { %v3906_v11 = vpop.eup %3905  ;;  %3561 = vmatprep.subr.bf16.mxu0 %v3560_v61  ;;  %v3568_v7 = vpack.c.bf16 %v3904_v5, %v3902_v0  ;;  %1284 = vmatprep.mubr.f32.mxu0 %v4295_v14  ;;  %3925 = vtanh.f32 %v393_v57  ;;  %v430_v0 = vadd.f32 %v4410_v35, %v278_v43  ;;  %v277_v61 = vmul.f32 %v4896_v6, %v4412_v36 }
  0xe0   :  { %v3908_v1 = vpop.eup %3907  ;;  %3442 = vmatmul.mubr.msk.f32.gmra.mrb[28].mxu1 %vm655_vm0, %v4592_v22  ;;  %3927 = vtanh.f32 %v425_v17  ;;  %v245_v17 = vmul.f32 %v4896_v6, %v4401_v27  ;;  %v395_v5 = vadd.f32 %v4399_v26, %v243_v41  ;;  %v4971_v20 = vrot.slane %v4852_v32, %v4435_v51 }
  0xe1   :  { %v3910_v9 = vpop.eup %3909  ;;  %3569 = vmatprep.subr.bf16.mxu1 %v3568_v7  ;;  %v3562_v16 = vpack.c.bf16 %v3908_v1, %v3906_v11  ;;  %1373 = vmatprep.mubr.f32.mxu1 %v4295_v14  ;;  %3929 = vtanh.f32 %v456_v3  ;;  %v4958_v11 = vrot.slane %v4852_v32, %v4429_v49  ;;  %v308_v1 = vmul.f32 %v4866_v45, %v4426_v47 }
  0xe2   :  { %v3912_v24 = vpop.eup %3911  ;;  %3439 = vmatmul.mubr.msk.f32.gmra.mrb[30].mxu0 %vm655_vm0, %v4623_v40  ;;  %3931 = vtanh.f32 %v488_v13  ;;  %v397_v10 = vadd.f32 %v4399_v26, %v245_v17  ;;  %v429_v42 = vadd.f32 %v4410_v35, %v277_v61  ;;  %v340_v49 = vmul.f32 %v4866_v45, %v4424_v46 }
  0xe3   :  { %v3914_v30 = vpop.eup %3913  ;;  %3563 = vmatpush1.bf16.msra.mxu0 %v3562_v16  ;;  %v3570_v21 = vpack.c.bf16 %v3912_v24, %v3910_v9  ;;  %1444 = vmatprep.mubr.f32.mxu0 %v4295_v14  ;;  %3933 = vtanh.f32 %v458_v8  ;;  %v460_v16 = vadd.f32 %v4442_v56, %v308_v1  ;;  %v342_v51 = vmul.f32 %v4870_v38, %v4424_v46 }
  0xe4   :  { %v3916_v34 = vpop.eup %3915  ;;  %3443 = vmatmul.mubr.msk.f32.gmra.mrb[30].mxu1 %vm655_vm0, %v4623_v40  ;;  %3935 = vtanh.f32 %v490_v12  ;;  %v492_v45 = vadd.f32 %v4440_v55, %v340_v49  ;;  %v4984_v58 = vrot.slane %v4852_v32, %v4449_v59  ;;  %v307_v28 = vmul.f32 %v4883_v62, %v4426_v47 }
  0xe5   :  { %v3918_v39 = vpop.eup %3917  ;;  %3571 = vmatpush1.bf16.msra.mxu1 %v3570_v21  ;;  %v3572_v15 = vpack.c.bf16 %v3916_v34, %v3914_v30  ;;  %1533 = vmatprep.mubr.f32.mxu1 %v4295_v14  ;;  %3937 = vtanh.f32 %v455_v23  ;;  %v339_v59 = vmul.f32 %v4883_v62, %v4424_v46  ;;  %v309_v32 = vmul.f32 %v4896_v6, %v4426_v47 }
  0xe6   :  { %v3920_v53 = vpop.eup %3919  ;;  %3444 = vmatmul.mubr.msk.f32.vlgmr.msra.gmra.mrb[32].mxu0 %vm655_vm0, %v4545_v33  ;;  %3939 = vtanh.f32 %v487_v29  ;;  %v459_v52 = vadd.f32 %v4442_v56, %v307_v28  ;;  %v280_v43 = vmul.f32 %v4954_v19, %v4412_v36  ;;  %v250_v41 = vmul.f32 %v4958_v11, %v4401_v27 }
  0xe7   :  { %v3922_v57 = vpop.eup %3921  ;;  %3573 = vmatprep.subr.bf16.mxu0 %v3572_v15  ;;  %v3580_v60 = vpack.c.bf16 %v3920_v53, %v3918_v39  ;;  %1450 = vmatprep.mubr.f32.mxu0 %v4295_v14  ;;  %3941 = vtanh.f32 %v457_v31  ;;  %v491_v62 = vadd.f32 %v4440_v55, %v339_v59  ;;  %v311_v59 = vmul.f32 %v4971_v20, %v4426_v47 }
  0xe8   :  { %v3924_v18 = vpop.eup %3923  ;;  %3448 = vmatmul.mubr.msk.f32.vlgmr.msra.gmra.mrb[32].mxu1 %vm655_vm0, %v4545_v33  ;;  %3943 = vtanh.f32 %v489_v44  ;;  %v427_v33 = vadd.f32 %v4410_v35, %v275_v54  ;;  %v341_v44 = vmul.f32 %v4896_v6, %v4424_v46 }
  0xe9   :  { %v3926_v3 = vpop.eup %3925  ;;  %3581 = vmatprep.subr.bf16.mxu1 %v3580_v60  ;;  %v3574_v4 = vpack.c.bf16 %v3924_v18, %v3922_v57  ;;  %1539 = vmatprep.mubr.f32.mxu1 %v4295_v14  ;;  %3945 = vtanh.f32 %v396_v37  ;;  %v461_v37 = vadd.f32 %v4442_v56, %v309_v32  ;;  %v432_v18 = vadd.f32 %v4410_v35, %v280_v43 }
  0xea   :  { %v3928_v13 = vpop.eup %3927  ;;  %3445 = vmatmul.mubr.msk.f32.gmra.mrb[34].mxu0 %vm655_vm0, %v4565_v63  ;;  %3947 = vtanh.f32 %v428_v48  ;;  %v493_v6 = vadd.f32 %v4440_v55, %v341_v44  ;;  %v282_v48 = vmul.f32 %v4958_v11, %v4412_v36  ;;  %v5089_v44 = vld [vmem:[%s5385_s3 + $0x18] sm:$0xff]  ;;  %v345_v43 = vmul.f32 %v4984_v58, %v4424_v46 }
  0xeb   :  { %v3930_v7 = vpop.eup %3929  ;;  %3575 = vmatpush1.bf16.msra.mxu0 %v3574_v4  ;;  %v3582_v8 = vpack.c.bf16 %v3928_v13, %v3926_v3  ;;  %3949 = vtanh.f32 %v398_v2  ;;  %1456 = vmatprep.mubr.f32.mxu0 %v4295_v14  ;;  %v247_v2 = vmul.f32 %v4971_v20, %v4401_v27  ;;  %v402_v4 = vadd.f32 %v4399_v26, %v250_v41 }
  0xec   :  { %v3932_v12 = vpop.eup %3931  ;;  %3449 = vmatmul.mubr.msk.f32.gmra.mrb[34].mxu1 %vm655_vm0, %v4565_v63  ;;  %3951 = vtanh.f32 %v430_v0  ;;  %v310_v63 = vmul.f32 %v4870_v38, %v4426_v47  ;;  %v494_v38 = vadd.f32 %v4440_v55, %v342_v51  ;;  %v279_v0 = vmul.f32 %v4971_v20, %v4412_v36 }
  0xed   :  { %v3934_v50 = vpop.eup %3933  ;;  %3583 = vmatpush1.bf16.msra.mxu1 %v3582_v8  ;;  %v3576_v9 = vpack.c.bf16 %v3932_v12, %v3930_v7  ;;  %1545 = vmatprep.mubr.f32.mxu1 %v4295_v14  ;;  %3953 = vtanh.f32 %v395_v5  ;;  %v249_v5 = vmul.f32 %v4984_v58, %v4401_v27  ;;  %v281_v7 = vmul.f32 %v4984_v58, %v4412_v36 }
  0xee   :  { %v3936_v23 = vpop.eup %3935  ;;  %3446 = vmatmul.mubr.msk.f32.gmra.mrb[36].mxu0 %vm655_vm0, %v4592_v22  ;;  %3955 = vtanh.f32 %v427_v33  ;;  %v462_v25 = vadd.f32 %v4442_v56, %v310_v63  ;;  %v434_v33 = vadd.f32 %v4410_v35, %v282_v48  ;;  %v399_v1 = vadd.f32 %v4399_v26, %v247_v2 }
  0xef   :  { %v3938_v24 = vpop.eup %3937  ;;  %3577 = vmatprep.subr.bf16.mxu0 %v3576_v9  ;;  %v3584_v29 = vpack.c.bf16 %v3936_v23, %v3934_v50  ;;  %1462 = vmatprep.mubr.f32.mxu0 %v4295_v14  ;;  %3957 = vtanh.f32 %v397_v10  ;;  %v431_v36 = vadd.f32 %v4410_v35, %v279_v0  ;;  %v401_v50 = vadd.f32 %v4399_v26, %v249_v5 }
  0xf0   :  { %v3940_v30 = vpop.eup %3939  ;;  %3450 = vmatmul.mubr.msk.f32.gmra.mrb[36].mxu1 %vm655_vm0, %v4592_v22  ;;  %3959 = vtanh.f32 %v429_v42  ;;  %v248_v22 = vmul.f32 %v4954_v19, %v4401_v27  ;;  %v5045_v27 = vld [vmem:[%s5385_s3 + $0x8] sm:$0xff]  ;;  %v312_v9 = vmul.f32 %v4954_v19, %v4426_v47  ;;  %v433_v63 = vadd.f32 %v4410_v35, %v281_v7 }
  0xf1   :  { %v3942_v21 = vpop.eup %3941  ;;  %3585 = vmatprep.subr.bf16.mxu1 %v3584_v29  ;;  %v3578_v31 = vpack.c.bf16 %v3940_v30, %v3938_v24  ;;  %1551 = vmatprep.mubr.f32.mxu1 %v4295_v14  ;;  %3961 = vtanh.f32 %v460_v16  ;;  %v344_v23 = vmul.f32 %v4954_v19, %v4424_v46  ;;  %v314_v24 = vmul.f32 %v4958_v11, %v4426_v47 }
  0xf2   :  { %v3944_v34 = vpop.eup %3943  ;;  %3447 = vmatmul.mubr.msk.f32.gmra.mrb[38].mxu0 %vm655_vm0, %v4623_v40  ;;  %3963 = vtanh.f32 %v492_v45  ;;  %v400_v60 = vadd.f32 %v4399_v26, %v248_v22  ;;  %v464_v26 = vadd.f32 %v4442_v56, %v312_v9  ;;  %v346_v19 = vmul.f32 %v4958_v11, %v4424_v46 }
  0xf3   :  { %v3946_v39 = vpop.eup %3945  ;;  %3579 = vmatpush1.bf16.msra.mxu0 %v3578_v31  ;;  %v3586_v15 = vpack.c.bf16 %v3944_v34, %v3942_v21  ;;  %1622 = vmatprep.mubr.f32.mxu0 %v4295_v14  ;;  %3965 = vtanh.f32 %v462_v25  ;;  %v5066_v25 = vld [vmem:[%s5385_s3 + $0x10] sm:$0xff]  ;;  %v496_v35 = vadd.f32 %v4440_v55, %v344_v23  ;;  %v343_v11 = vmul.f32 %v4971_v20, %v4424_v46 }
  0xf4   :  { %v3948_v53 = vpop.eup %3947  ;;  %3451 = vmatmul.mubr.msk.f32.gmra.mrb[38].mxu1 %vm655_vm0, %v4623_v40  ;;  %3967 = vtanh.f32 %v494_v38  ;;  %v5024_v40 = vld [vmem:[%s5385_s3] sm:$0xff]  ;;  %v466_v38 = vadd.f32 %v4442_v56, %v314_v24  ;;  %v498_v21 = vadd.f32 %v4440_v55, %v346_v19  ;;  %v463_v22 = vadd.f32 %v4442_v56, %v311_v59 }
  0xf5   :  { %v3950_v54 = vpop.eup %3949  ;;  %3587 = vmatpush1.bf16.msra.mxu1 %v3586_v15  ;;  %v3588_v57 = vpack.c.bf16 %v3948_v53, %v3946_v39  ;;  %1711 = vmatprep.mubr.f32.mxu1 %v4295_v14  ;;  %3969 = vtanh.f32 %v459_v52  ;;  %v313_v34 = vmul.f32 %v4984_v58, %v4426_v47  ;;  %v495_v20 = vadd.f32 %v4440_v55, %v343_v11 }
  0xf6   :  { %v3952_v17 = vpop.eup %3951  ;;  %3452 = vmatmul.mubr.msk.f32.vlgmr.msra.gmra.mrb[40].mxu0 %vm655_vm0, %v5024_v40  ;;  %3971 = vtanh.f32 %v491_v62  ;;  %v497_v41 = vadd.f32 %v4440_v55, %v345_v43 }
  0xf7   :  { %v3954_v61 = vpop.eup %3953  ;;  %3589 = vmatprep.subr.bf16.mxu0 %v3588_v57  ;;  %v3596_v3 = vpack.c.bf16 %v3952_v17, %v3950_v54  ;;  %1628 = vmatprep.mubr.f32.mxu0 %v4295_v14  ;;  %3973 = vtanh.f32 %v461_v37  ;;  %v465_v47 = vadd.f32 %v4442_v56, %v313_v34 }
  0xf8   :  { %v3956_v13 = vpop.eup %3955  ;;  %3456 = vmatmul.mubr.msk.f32.vlgmr.msra.gmra.mrb[40].mxu1 %vm655_vm0, %v5024_v40  ;;  %3975 = vtanh.f32 %v493_v6 }
  0xf9   :  { %v3958_v8 = vpop.eup %3957  ;;  %3597 = vmatprep.subr.bf16.mxu1 %v3596_v3  ;;  %v3590_v10 = vpack.c.bf16 %v3956_v13, %v3954_v61  ;;  %1717 = vmatprep.mubr.f32.mxu1 %v4295_v14  ;;  %3977 = vtanh.f32 %v400_v60 }
  0xfa   :  { %v3960_v12 = vpop.eup %3959  ;;  %3453 = vmatmul.mubr.msk.f32.gmra.mrb[42].mxu0 %vm655_vm0, %v5045_v27  ;;  %3979 = vtanh.f32 %v432_v18 }
  0xfb   :  { %v3962_v42 = vpop.eup %3961  ;;  %3591 = vmatpush1.bf16.msra.mxu0 %v3590_v10  ;;  %v3598_v49 = vpack.c.bf16 %v3960_v12, %v3958_v8  ;;  %3981 = vtanh.f32 %v402_v4  ;;  %1634 = vmatprep.mubr.f32.mxu0 %v4295_v14 }
  0xfc   :  { %v3964_v16 = vpop.eup %3963  ;;  %3457 = vmatmul.mubr.msk.f32.gmra.mrb[42].mxu1 %vm655_vm0, %v5045_v27  ;;  %3983 = vtanh.f32 %v434_v33 }
  0xfd   :  { %v3966_v45 = vpop.eup %3965  ;;  %3599 = vmatpush1.bf16.msra.mxu1 %v3598_v49  ;;  %v3592_v51 = vpack.c.bf16 %v3964_v16, %v3962_v42  ;;  %1723 = vmatprep.mubr.f32.mxu1 %v4295_v14  ;;  %3985 = vtanh.f32 %v399_v1 }
  0xfe   :  { %v3968_v29 = vpop.eup %3967  ;;  %3454 = vmatmul.mubr.msk.f32.gmra.mrb[44].mxu0 %vm655_vm0, %v5066_v25  ;;  %3987 = vtanh.f32 %v431_v36 }
  0xff   :  { %v3970_v28 = vpop.eup %3969  ;;  %3593 = vmatprep.subr.bf16.mxu0 %v3592_v51  ;;  %v3600_v30 = vpack.c.bf16 %v3968_v29, %v3966_v45  ;;  %1640 = vmatprep.mubr.f32.mxu0 %v4295_v14  ;;  %3989 = vtanh.f32 %v401_v50  ;;  %v5155_v50 = vpop.permute.xlu1 %642 }
 0x100   :  { %v3972_v32 = vpop.eup %3971  ;;  %3458 = vmatmul.mubr.msk.f32.gmra.mrb[44].mxu1 %vm655_vm0, %v5066_v25  ;;  %3991 = vtanh.f32 %v433_v63 }
 0x101   :  { %v3974_v31 = vpop.eup %3973  ;;  %3601 = vmatprep.subr.bf16.mxu1 %v3600_v30  ;;  %v3594_v52 = vpack.c.bf16 %v3972_v32, %v3970_v28  ;;  %1729 = vmatprep.mubr.f32.mxu1 %v4295_v14  ;;  %3993 = vtanh.f32 %v464_v26 }
 0x102   :  { %v3976_v62 = vpop.eup %3975  ;;  %3455 = vmatmul.mubr.msk.f32.gmra.mrb[46].mxu0 %vm655_vm0, %v5089_v44  ;;  %3995 = vtanh.f32 %v496_v35 }
 0x103   :  { %v3978_v39 = vpop.eup %3977  ;;  %3595 = vmatpush1.bf16.msra.mxu0 %v3594_v52  ;;  %v3602_v15 = vpack.c.bf16 %v3976_v62, %v3974_v31  ;;  %1800 = vmatprep.mubr.f32.mxu0 %v4295_v14  ;;  %3997 = vtanh.f32 %v466_v38 }
 0x104   :  { %v3980_v37 = vpop.eup %3979  ;;  %3459 = vmatmul.mubr.msk.f32.gmra.mrb[46].mxu1 %vm655_vm0, %v5089_v44  ;;  %3999 = vtanh.f32 %v498_v21  ;;  %v5167_v21 = vpop.permute.xlu1 %652 }
 0x105   :  { %v3982_v53 = vpop.eup %3981  ;;  %3603 = vmatpush1.bf16.msra.mxu1 %v3602_v15  ;;  %v3604_v6 = vpack.c.bf16 %v3980_v37, %v3978_v39  ;;  %1889 = vmatprep.mubr.f32.mxu1 %v4295_v14  ;;  %4001 = vtanh.f32 %v463_v22 }
 0x106   :  { %v3984_v46 = vpop.eup %3983  ;;  %3460 = vmatmul.mubr.msk.f32.vlgmr.msra.gmra.mrb[48].mxu0 %vm655_vm0, %v5024_v40  ;;  %4003 = vtanh.f32 %v495_v20 }
 0x107   :  { %v3986_v58 = vpop.eup %3985  ;;  %3605 = vmatprep.subr.bf16.mxu0 %v3604_v6  ;;  %v3612_v56 = vpack.c.bf16 %v3984_v46, %v3982_v53  ;;  %1806 = vmatprep.mubr.f32.mxu0 %v4295_v14  ;;  %4005 = vtanh.f32 %v465_v47 }
 0x108   :  { %v3988_v48 = vpop.eup %3987  ;;  %3464 = vmatmul.mubr.msk.f32.vlgmr.msra.gmra.mrb[48].mxu1 %vm655_vm0, %v5024_v40  ;;  %4007 = vtanh.f32 %v497_v41 }
 0x109   :  { %v3990_v55 = vpop.eup %3989  ;;  %3613 = vmatprep.subr.bf16.mxu1 %v3612_v56  ;;  %v3606_v54 = vpack.c.bf16 %v3988_v48, %v3986_v58  ;;  %1895 = vmatprep.mubr.f32.mxu1 %v4295_v14 }
 0x10a   :  { %v3992_v57 = vpop.eup %3991  ;;  %3461 = vmatmul.mubr.msk.f32.gmra.mrb[50].mxu0 %vm655_vm0, %v5045_v27 }
 0x10b   :  { %v3994_v60 = vpop.eup %3993  ;;  %3607 = vmatpush1.bf16.msra.mxu0 %v3606_v54  ;;  %v3614_v2 = vpack.c.bf16 %v3992_v57, %v3990_v55  ;;  %1812 = vmatprep.mubr.f32.mxu0 %v4295_v14 }
 0x10c   :  { %v3996_v17 = vpop.eup %3995  ;;  %3465 = vmatmul.mubr.msk.f32.gmra.mrb[50].mxu1 %vm655_vm0, %v5045_v27 }
 0x10d   :  { %v3998_v18 = vpop.eup %3997  ;;  %3615 = vmatpush1.bf16.msra.mxu1 %v3614_v2  ;;  %v3608_v0 = vpack.c.bf16 %v3996_v17, %v3994_v60  ;;  %1901 = vmatprep.mubr.f32.mxu1 %v4295_v14 }
 0x10e   :  { %v4000_v61 = vpop.eup %3999  ;;  %3462 = vmatmul.mubr.msk.f32.gmra.mrb[52].mxu0 %vm655_vm0, %v5066_v25 }
 0x10f   :  { %v4002_v3 = vpop.eup %4001  ;;  %3609 = vmatprep.subr.bf16.mxu0 %v3608_v0  ;;  %v3616_v4 = vpack.c.bf16 %v4000_v61, %v3998_v18  ;;  %1818 = vmatprep.mubr.f32.mxu0 %v4295_v14 }
 0x110   :  { %v4004_v5 = vpop.eup %4003  ;;  %3466 = vmatmul.mubr.msk.f32.gmra.mrb[52].mxu1 %vm655_vm0, %v5066_v25 }
 0x111   :  { %v4006_v13 = vpop.eup %4005  ;;  %3617 = vmatprep.subr.bf16.mxu1 %v3616_v4  ;;  %v3610_v33 = vpack.c.bf16 %v4004_v5, %v4002_v3  ;;  %1907 = vmatprep.mubr.f32.mxu1 %v4295_v14 }
 0x112   :  { %v4008_v7 = vpop.eup %4007  ;;  %3463 = vmatmul.mubr.msk.f32.gmra.mrb[54].mxu0 %vm655_vm0, %v5089_v44 }
 0x113   :  { %3611 = vmatpush1.bf16.msra.mxu0 %v3610_v33  ;;  %v3618_v8 = vpack.c.bf16 %v4008_v7, %v4006_v13  ;;  %1978 = vmatprep.mubr.f32.mxu0 %v4295_v14 }
 0x114   :  { %3467 = vmatmul.mubr.msk.f32.gmra.mrb[54].mxu1 %vm655_vm0, %v5089_v44 }
 0x115   :  { %3619 = vmatpush1.bf16.msra.mxu1 %v3618_v8  ;;  %2067 = vmatprep.mubr.f32.mxu1 %v4295_v14 }
 0x116   :  { %3468 = vmatmul.mubr.msk.f32.vlgmr.msra.gmra.mrb[56].mxu0 %vm655_vm0, %v5024_v40 }
 0x117   :  { %1984 = vmatprep.mubr.f32.mxu0 %v4295_v14 }
 0x118   :  { %3472 = vmatmul.mubr.msk.f32.vlgmr.msra.gmra.mrb[56].mxu1 %vm655_vm0, %v5024_v40  ;;  %v5150_v40 = vpop.permute.xlu0 %637 }
 0x119   :  { %2073 = vmatprep.mubr.f32.mxu1 %v4295_v14 }
 0x11a   :  { %3469 = vmatmul.mubr.msk.f32.gmra.mrb[58].mxu0 %vm655_vm0, %v5045_v27 }
 0x11b   :  { %1990 = vmatprep.mubr.f32.mxu0 %v4295_v14 }
 0x11c   :  { %3473 = vmatmul.mubr.msk.f32.gmra.mrb[58].mxu1 %vm655_vm0, %v5045_v27  ;;  %v5161_v29 = vpop.permute.xlu0 %647 }
 0x11d   :  { %2079 = vmatprep.mubr.f32.mxu1 %v4295_v14 }
 0x11e   :  { %3470 = vmatmul.mubr.msk.f32.gmra.mrb[60].mxu0 %vm655_vm0, %v5066_v25 }
 0x11f   :  { %1996 = vmatprep.mubr.f32.mxu0 %v4295_v14 }
 0x120   :  { %3474 = vmatmul.mubr.msk.f32.gmra.mrb[60].mxu1 %vm655_vm0, %v5066_v25 }
 0x121   :  { %2085 = vmatprep.mubr.f32.mxu1 %v4295_v14 }
 0x122   :  { %3471 = vmatmul.mubr.msk.f32.gmra.mrb[62].mxu0 %vm655_vm0, %v5089_v44 }
 0x123   :  { %2294 = vmatprep.mubr.f32.mxu0 %v4295_v14 }
 0x124   :  { %3475 = vmatmul.mubr.msk.f32.gmra.mrb[62].mxu1 %vm655_vm0, %v5089_v44 }
 0x125   :  { %2365 = vmatprep.mubr.f32.mxu1 %v4295_v14 }
 0x179   :  { %v734_v10 = vpop.f32.mrb[0].mxu0 }
 0x17a   :  { %v735_v1 = vadd.f32 %v734_v10, %v5150_v40  ;;  %v736_v12 = vpop.f32.mrb[1].mxu0 }
 0x17b   :  { %v823_v27 = vpop.f32.mrb[0].mxu1  ;;  %v737_v36 = vadd.f32 %v736_v12, %v5150_v40 }
 0x17c   :  { %4009 = vtanh.f32 %v735_v1  ;;  %v824_v42 = vadd.f32 %v823_v27, %v5150_v40  ;;  %v825_v49 = vpop.f32.mrb[1].mxu1 }
 0x17d   :  { %4011 = vtanh.f32 %v737_v36  ;;  %v826_v9 = vadd.f32 %v825_v49, %v5150_v40  ;;  %v740_v16 = vpop.f32.mrb[2].mxu0 }
 0x17e   :  { %4013 = vtanh.f32 %v824_v42  ;;  %v741_v63 = vadd.f32 %v740_v16, %v5155_v50  ;;  %v742_v23 = vpop.f32.mrb[3].mxu0 }
 0x17f   :  { %4015 = vtanh.f32 %v826_v9  ;;  %v829_v45 = vpop.f32.mrb[2].mxu1  ;;  %v743_v51 = vadd.f32 %v742_v23, %v5155_v50 }
 0x180   :  { %4017 = vtanh.f32 %v741_v63  ;;  %v830_v26 = vadd.f32 %v829_v45, %v5155_v50  ;;  %v831_v24 = vpop.f32.mrb[3].mxu1 }
 0x181   :  { %4019 = vtanh.f32 %v743_v51  ;;  %v832_v25 = vadd.f32 %v831_v24, %v5155_v50  ;;  %v746_v35 = vpop.f32.mrb[4].mxu0 }
 0x182   :  { %4021 = vtanh.f32 %v830_v26  ;;  %v747_v19 = vadd.f32 %v746_v35, %v5161_v29  ;;  %v748_v28 = vpop.f32.mrb[5].mxu0 }
 0x183   :  { %4023 = vtanh.f32 %v832_v25  ;;  %v835_v30 = vpop.f32.mrb[4].mxu1  ;;  %v749_v38 = vadd.f32 %v748_v28, %v5161_v29 }
 0x184   :  { %4025 = vtanh.f32 %v747_v19  ;;  %v836_v59 = vadd.f32 %v835_v30, %v5161_v29  ;;  %v837_v32 = vpop.f32.mrb[5].mxu1 }
 0x185   :  { %4027 = vtanh.f32 %v749_v38  ;;  %v838_v11 = vadd.f32 %v837_v32, %v5161_v29  ;;  %v752_v31 = vpop.f32.mrb[6].mxu0 }
 0x186   :  { %v4010_v52 = vpop.eup %4009  ;;  %4029 = vtanh.f32 %v836_v59  ;;  %v753_v22 = vadd.f32 %v752_v31, %v5167_v21  ;;  %v754_v34 = vpop.f32.mrb[7].mxu0 }
 0x187   :  { %v4012_v62 = vpop.eup %4011  ;;  %4031 = vtanh.f32 %v838_v11  ;;  %v841_v44 = vpop.f32.mrb[6].mxu1  ;;  %v755_v20 = vadd.f32 %v754_v34, %v5167_v21 }
 0x188   :  { %v4014_v43 = vpop.eup %4013  ;;  %4033 = vtanh.f32 %v753_v22  ;;  %v842_v39 = vadd.f32 %v841_v44, %v5167_v21  ;;  %v843_v15 = vpop.f32.mrb[7].mxu1 }
 0x189   :  { %v4016_v47 = vpop.eup %4015  ;;  %4035 = vtanh.f32 %v755_v20  ;;  %v844_v37 = vadd.f32 %v843_v15, %v5167_v21  ;;  %v912_v41 = vpop.f32.mrb[8].mxu0 }
 0x18a   :  { %v4018_v53 = vpop.eup %4017  ;;  %4037 = vtanh.f32 %v842_v39  ;;  %v913_v6 = vadd.f32 %v912_v41, %v5150_v40  ;;  %v914_v46 = vpop.f32.mrb[9].mxu0 }
 0x18b   :  { %v4020_v58 = vpop.eup %4019  ;;  %4039 = vtanh.f32 %v844_v37  ;;  %v1001_v56 = vpop.f32.mrb[8].mxu1  ;;  %v915_v48 = vadd.f32 %v914_v46, %v5150_v40  ;;  %v3622_v55 = vpack.c.bf16 %v4018_v53, %v4010_v52 }
 0x18c   :  { %v4022_v54 = vpop.eup %4021  ;;  %4041 = vtanh.f32 %v913_v6  ;;  %v1002_v57 = vadd.f32 %v1001_v56, %v5150_v40  ;;  %v1003_v60 = vpop.f32.mrb[9].mxu1  ;;  %v3620_v2 = vpack.c.bf16 %v4020_v58, %v4012_v62  ;;  %v5191_v62 = vld [vmem:[%s5387_s5] sm:$0xff] }
 0x18d   :  { %v4024_v17 = vpop.eup %4023  ;;  %4043 = vtanh.f32 %v915_v48  ;;  %v1004_v18 = vadd.f32 %v1003_v60, %v5150_v40  ;;  %v918_v0 = vpop.f32.mrb[10].mxu0  ;;  %v3630_v61 = vpack.c.bf16 %v4022_v54, %v4014_v43 }
 0x18e   :  { %v4026_v3 = vpop.eup %4025  ;;  %4045 = vtanh.f32 %v1002_v57  ;;  %v919_v4 = vadd.f32 %v918_v0, %v5155_v50  ;;  %v920_v5 = vpop.f32.mrb[11].mxu0  ;;  %3621 = vmatprep.subr.bf16.mxu0 %v3620_v2  ;;  %v3628_v13 = vpack.c.bf16 %v4024_v17, %v4016_v47 }
 0x18f   :  { %v4028_v33 = vpop.eup %4027  ;;  %4047 = vtanh.f32 %v1004_v18  ;;  %v1007_v7 = vpop.f32.mrb[10].mxu1  ;;  %v921_v8 = vadd.f32 %v920_v5, %v5155_v50  ;;  %3623 = vmatpush1.bf16.msra.mxu0 %v3622_v55 }
 0x190   :  { %v4030_v10 = vpop.eup %4029  ;;  %4049 = vtanh.f32 %v919_v4  ;;  %v1008_v1 = vadd.f32 %v1007_v7, %v5155_v50  ;;  %v1009_v12 = vpop.f32.mrb[11].mxu1  ;;  %3629 = vmatprep.subr.bf16.mxu1 %v3628_v13 }
 0x191   :  { %v4032_v27 = vpop.eup %4031  ;;  %4051 = vtanh.f32 %v921_v8  ;;  %v1010_v36 = vadd.f32 %v1009_v12, %v5155_v50  ;;  %3631 = vmatpush1.bf16.msra.mxu1 %v3630_v61  ;;  %v924_v42 = vpop.f32.mrb[12].mxu0 }
 0x192   :  { %v4034_v49 = vpop.eup %4033  ;;  %4053 = vtanh.f32 %v1008_v1  ;;  %v925_v9 = vadd.f32 %v924_v42, %v5161_v29  ;;  %v926_v16 = vpop.f32.mrb[13].mxu0 }
 0x193   :  { %v4036_v63 = vpop.eup %4035  ;;  %4055 = vtanh.f32 %v1010_v36  ;;  %v1013_v23 = vpop.f32.mrb[12].mxu1  ;;  %v927_v45 = vadd.f32 %v926_v16, %v5161_v29  ;;  %v3626_v51 = vpack.c.bf16 %v4034_v49, %v4026_v3 }
 0x194   :  { %v4038_v26 = vpop.eup %4037  ;;  %4057 = vtanh.f32 %v925_v9  ;;  %v1014_v24 = vadd.f32 %v1013_v23, %v5161_v29  ;;  %v1015_v25 = vpop.f32.mrb[13].mxu1  ;;  %v3624_v35 = vpack.c.bf16 %v4036_v63, %v4028_v33 }
 0x195   :  { %v4040_v19 = vpop.eup %4039  ;;  %4059 = vtanh.f32 %v927_v45  ;;  %v1016_v28 = vadd.f32 %v1015_v25, %v5161_v29  ;;  %v930_v30 = vpop.f32.mrb[14].mxu0  ;;  %v3634_v38 = vpack.c.bf16 %v4038_v26, %v4030_v10 }
 0x196   :  { %v4042_v59 = vpop.eup %4041  ;;  %4061 = vtanh.f32 %v1014_v24  ;;  %v931_v32 = vadd.f32 %v930_v30, %v5167_v21  ;;  %v932_v11 = vpop.f32.mrb[15].mxu0  ;;  %3625 = vmatprep.subr.bf16.mxu0 %v3624_v35  ;;  %v3632_v31 = vpack.c.bf16 %v4040_v19, %v4032_v27 }
 0x197   :  { %v4044_v52 = vpop.eup %4043  ;;  %4063 = vtanh.f32 %v1016_v28  ;;  %v1019_v22 = vpop.f32.mrb[14].mxu1  ;;  %v933_v34 = vadd.f32 %v932_v11, %v5167_v21  ;;  %3627 = vmatpush1.bf16.msra.mxu0 %v3626_v51 }
 0x198   :  { %v4046_v44 = vpop.eup %4045  ;;  %4065 = vtanh.f32 %v931_v32  ;;  %v1020_v20 = vadd.f32 %v1019_v22, %v5167_v21  ;;  %v1021_v43 = vpop.f32.mrb[15].mxu1  ;;  %3633 = vmatprep.subr.bf16.mxu1 %v3632_v31 }
 0x199   :  { %v4048_v39 = vpop.eup %4047  ;;  %4067 = vtanh.f32 %v933_v34  ;;  %v1022_v15 = vadd.f32 %v1021_v43, %v5167_v21  ;;  %3635 = vmatpush1.bf16.msra.mxu1 %v3634_v38  ;;  %v1090_v47 = vpop.f32.mrb[16].mxu0 }
 0x19a   :  { %v4050_v37 = vpop.eup %4049  ;;  %4069 = vtanh.f32 %v1020_v20  ;;  %v1091_v41 = vadd.f32 %v1090_v47, %v5150_v40  ;;  %v1092_v53 = vpop.f32.mrb[17].mxu0  ;;  %3476 = vmatmul.mubr.msk.f32.vlgmr.msra.gmra.mrb[64].mxu0 %vm655_vm0, %v5191_v62 }
 0x19b   :  { %v4052_v6 = vpop.eup %4051  ;;  %4071 = vtanh.f32 %v1022_v15  ;;  %v1179_v46 = vpop.f32.mrb[16].mxu1  ;;  %v1093_v58 = vadd.f32 %v1092_v53, %v5150_v40  ;;  %v3638_v56 = vpack.c.bf16 %v4050_v37, %v4042_v59  ;;  %2436 = vmatprep.mubr.f32.mxu0 %v4295_v14 }
 0x19c   :  { %v4054_v48 = vpop.eup %4053  ;;  %4073 = vtanh.f32 %v1091_v41  ;;  %v1180_v55 = vadd.f32 %v1179_v46, %v5150_v40  ;;  %v1181_v54 = vpop.f32.mrb[17].mxu1  ;;  %3477 = vmatmul.mubr.msk.f32.vlgmr.msra.gmra.mrb[64].mxu1 %vm655_vm0, %v5191_v62  ;;  %v3636_v57 = vpack.c.bf16 %v4052_v6, %v4044_v52 }
 0x19d   :  { %v4056_v60 = vpop.eup %4055  ;;  %4075 = vtanh.f32 %v1093_v58  ;;  %v1182_v2 = vadd.f32 %v1181_v54, %v5150_v40  ;;  %v1096_v17 = vpop.f32.mrb[18].mxu0  ;;  %v3646_v18 = vpack.c.bf16 %v4054_v48, %v4046_v44  ;;  %2507 = vmatprep.mubr.f32.mxu1 %v4295_v14 }
 0x19e   :  { %v4058_v0 = vpop.eup %4057  ;;  %4077 = vtanh.f32 %v1180_v55  ;;  %v1097_v61 = vadd.f32 %v1096_v17, %v5155_v50  ;;  %v1098_v3 = vpop.f32.mrb[19].mxu0  ;;  %3637 = vmatprep.subr.bf16.mxu0 %v3636_v57  ;;  %v3644_v4 = vpack.c.bf16 %v4056_v60, %v4048_v39 }
 0x19f   :  { %v4060_v5 = vpop.eup %4059  ;;  %4079 = vtanh.f32 %v1182_v2  ;;  %v1185_v13 = vpop.f32.mrb[18].mxu1  ;;  %v1099_v33 = vadd.f32 %v1098_v3, %v5155_v50  ;;  %3639 = vmatpush1.bf16.msra.mxu0 %v3638_v56 }
 0x1a0   :  { %v4062_v7 = vpop.eup %4061  ;;  %4081 = vtanh.f32 %v1097_v61  ;;  %v1186_v8 = vadd.f32 %v1185_v13, %v5155_v50  ;;  %v1187_v10 = vpop.f32.mrb[19].mxu1  ;;  %3645 = vmatprep.subr.bf16.mxu1 %v3644_v4 }
 0x1a1   :  { %v4064_v1 = vpop.eup %4063  ;;  %4083 = vtanh.f32 %v1099_v33  ;;  %v1188_v12 = vadd.f32 %v1187_v10, %v5155_v50  ;;  %3647 = vmatpush1.bf16.msra.mxu1 %v3646_v18  ;;  %v1102_v27 = vpop.f32.mrb[20].mxu0 }
 0x1a2   :  { %v4066_v36 = vpop.eup %4065  ;;  %4085 = vtanh.f32 %v1186_v8  ;;  %v1103_v42 = vadd.f32 %v1102_v27, %v5161_v29  ;;  %v1104_v49 = vpop.f32.mrb[21].mxu0 }
 0x1a3   :  { %v4068_v9 = vpop.eup %4067  ;;  %4087 = vtanh.f32 %v1188_v12  ;;  %v1191_v16 = vpop.f32.mrb[20].mxu1  ;;  %v1105_v63 = vadd.f32 %v1104_v49, %v5161_v29  ;;  %v3642_v23 = vpack.c.bf16 %v4066_v36, %v4058_v0 }
 0x1a4   :  { %v4070_v45 = vpop.eup %4069  ;;  %4089 = vtanh.f32 %v1103_v42  ;;  %v1192_v51 = vadd.f32 %v1191_v16, %v5161_v29  ;;  %v1193_v26 = vpop.f32.mrb[21].mxu1  ;;  %v3640_v24 = vpack.c.bf16 %v4068_v9, %v4060_v5 }
 0x1a5   :  { %v4072_v25 = vpop.eup %4071  ;;  %4091 = vtanh.f32 %v1105_v63  ;;  %v1194_v35 = vadd.f32 %v1193_v26, %v5161_v29  ;;  %v1108_v19 = vpop.f32.mrb[22].mxu0  ;;  %v3650_v28 = vpack.c.bf16 %v4070_v45, %v4062_v7 }
 0x1a6   :  { %v4074_v30 = vpop.eup %4073  ;;  %4093 = vtanh.f32 %v1192_v51  ;;  %v1109_v38 = vadd.f32 %v1108_v19, %v5167_v21  ;;  %v1110_v59 = vpop.f32.mrb[23].mxu0  ;;  %3641 = vmatprep.subr.bf16.mxu0 %v3640_v24  ;;  %v3648_v32 = vpack.c.bf16 %v4072_v25, %v4064_v1 }
 0x1a7   :  { %v4076_v11 = vpop.eup %4075  ;;  %4095 = vtanh.f32 %v1194_v35  ;;  %v1197_v31 = vpop.f32.mrb[22].mxu1  ;;  %v1111_v52 = vadd.f32 %v1110_v59, %v5167_v21  ;;  %3643 = vmatpush1.bf16.msra.mxu0 %v3642_v23 }
 0x1a8   :  { %v4078_v22 = vpop.eup %4077  ;;  %4097 = vtanh.f32 %v1109_v38  ;;  %v1198_v34 = vadd.f32 %v1197_v31, %v5167_v21  ;;  %v1199_v44 = vpop.f32.mrb[23].mxu1  ;;  %3649 = vmatprep.subr.bf16.mxu1 %v3648_v32 }
 0x1a9   :  { %v4080_v20 = vpop.eup %4079  ;;  %4099 = vtanh.f32 %v1111_v52  ;;  %v1200_v43 = vadd.f32 %v1199_v44, %v5167_v21  ;;  %3651 = vmatpush1.bf16.msra.mxu1 %v3650_v28  ;;  %v1268_v39 = vpop.f32.mrb[24].mxu0 }
 0x1aa   :  { %v4082_v15 = vpop.eup %4081  ;;  %4101 = vtanh.f32 %v1198_v34  ;;  %v1269_v47 = vadd.f32 %v1268_v39, %v5150_v40  ;;  %v1270_v37 = vpop.f32.mrb[25].mxu0  ;;  %3478 = vmatmul.mubr.msk.f32.vlgmr.msra.gmra.mrb[66].mxu0 %vm655_vm0, %v5191_v62 }
 0x1ab   :  { %v4084_v41 = vpop.eup %4083  ;;  %4103 = vtanh.f32 %v1200_v43  ;;  %v1357_v53 = vpop.f32.mrb[24].mxu1  ;;  %v1271_v6 = vadd.f32 %v1270_v37, %v5150_v40  ;;  %v3654_v46 = vpack.c.bf16 %v4082_v15, %v4074_v30  ;;  %2578 = vmatprep.mubr.f32.mxu0 %v4295_v14 }
 0x1ac   :  { %v4086_v58 = vpop.eup %4085  ;;  %4105 = vtanh.f32 %v1269_v47  ;;  %v1358_v56 = vadd.f32 %v1357_v53, %v5150_v40  ;;  %v1359_v48 = vpop.f32.mrb[25].mxu1  ;;  %3479 = vmatmul.mubr.msk.f32.vlgmr.msra.gmra.mrb[66].mxu1 %vm655_vm0, %v5191_v62  ;;  %v3652_v55 = vpack.c.bf16 %v4084_v41, %v4076_v11 }
 0x1ad   :  { %v4088_v54 = vpop.eup %4087  ;;  %4107 = vtanh.f32 %v1271_v6  ;;  %v1360_v57 = vadd.f32 %v1359_v48, %v5150_v40  ;;  %v1274_v60 = vpop.f32.mrb[26].mxu0  ;;  %v3662_v2 = vpack.c.bf16 %v4086_v58, %v4078_v22  ;;  %2649 = vmatprep.mubr.f32.mxu1 %v4295_v14 }
 0x1ae   :  { %v4090_v17 = vpop.eup %4089  ;;  %4109 = vtanh.f32 %v1358_v56  ;;  %v1275_v18 = vadd.f32 %v1274_v60, %v5155_v50  ;;  %v1276_v0 = vpop.f32.mrb[27].mxu0  ;;  %3653 = vmatprep.subr.bf16.mxu0 %v3652_v55  ;;  %v3660_v61 = vpack.c.bf16 %v4088_v54, %v4080_v20 }
 0x1af   :  { %v4092_v3 = vpop.eup %4091  ;;  %4111 = vtanh.f32 %v1360_v57  ;;  %v1363_v4 = vpop.f32.mrb[26].mxu1  ;;  %v1277_v5 = vadd.f32 %v1276_v0, %v5155_v50  ;;  %3655 = vmatpush1.bf16.msra.mxu0 %v3654_v46 }
 0x1b0   :  { %v4094_v13 = vpop.eup %4093  ;;  %4113 = vtanh.f32 %v1275_v18  ;;  %v1364_v33 = vadd.f32 %v1363_v4, %v5155_v50  ;;  %v1365_v7 = vpop.f32.mrb[27].mxu1  ;;  %3661 = vmatprep.subr.bf16.mxu1 %v3660_v61 }
 0x1b1   :  { %v4096_v8 = vpop.eup %4095  ;;  %4115 = vtanh.f32 %v1277_v5  ;;  %v1366_v10 = vadd.f32 %v1365_v7, %v5155_v50  ;;  %3663 = vmatpush1.bf16.msra.mxu1 %v3662_v2  ;;  %v1280_v1 = vpop.f32.mrb[28].mxu0 }
 0x1b2   :  { %v4098_v12 = vpop.eup %4097  ;;  %4117 = vtanh.f32 %v1364_v33  ;;  %v1281_v27 = vadd.f32 %v1280_v1, %v5161_v29  ;;  %v1282_v36 = vpop.f32.mrb[29].mxu0 }
 0x1b3   :  { %v4100_v42 = vpop.eup %4099  ;;  %4119 = vtanh.f32 %v1366_v10  ;;  %v1369_v49 = vpop.f32.mrb[28].mxu1  ;;  %v1283_v9 = vadd.f32 %v1282_v36, %v5161_v29  ;;  %v3658_v16 = vpack.c.bf16 %v4098_v12, %v4090_v17 }
 0x1b4   :  { %v4102_v63 = vpop.eup %4101  ;;  %4121 = vtanh.f32 %v1281_v27  ;;  %v1370_v23 = vadd.f32 %v1369_v49, %v5161_v29  ;;  %v1371_v45 = vpop.f32.mrb[29].mxu1  ;;  %v3656_v51 = vpack.c.bf16 %v4100_v42, %v4092_v3 }
 0x1b5   :  { %v4104_v26 = vpop.eup %4103  ;;  %4123 = vtanh.f32 %v1283_v9  ;;  %v1372_v24 = vadd.f32 %v1371_v45, %v5161_v29  ;;  %v1286_v25 = vpop.f32.mrb[30].mxu0  ;;  %v3666_v35 = vpack.c.bf16 %v4102_v63, %v4094_v13 }
 0x1b6   :  { %v4106_v19 = vpop.eup %4105  ;;  %4125 = vtanh.f32 %v1370_v23  ;;  %v1287_v28 = vadd.f32 %v1286_v25, %v5167_v21  ;;  %v1288_v30 = vpop.f32.mrb[31].mxu0  ;;  %3657 = vmatprep.subr.bf16.mxu0 %v3656_v51  ;;  %v3664_v38 = vpack.c.bf16 %v4104_v26, %v4096_v8 }
 0x1b7   :  { %v4108_v59 = vpop.eup %4107  ;;  %4127 = vtanh.f32 %v1372_v24  ;;  %v1375_v32 = vpop.f32.mrb[30].mxu1  ;;  %v1289_v11 = vadd.f32 %v1288_v30, %v5167_v21  ;;  %3659 = vmatpush1.bf16.msra.mxu0 %v3658_v16 }
 0x1b8   :  { %v4110_v31 = vpop.eup %4109  ;;  %4129 = vtanh.f32 %v1287_v28  ;;  %v1376_v52 = vadd.f32 %v1375_v32, %v5167_v21  ;;  %v1377_v22 = vpop.f32.mrb[31].mxu1  ;;  %3665 = vmatprep.subr.bf16.mxu1 %v3664_v38 }
 0x1b9   :  { %v4112_v34 = vpop.eup %4111  ;;  %4131 = vtanh.f32 %v1289_v11  ;;  %v1378_v44 = vadd.f32 %v1377_v22, %v5167_v21  ;;  %3667 = vmatpush1.bf16.msra.mxu1 %v3666_v35  ;;  %v1446_v20 = vpop.f32.mrb[32].mxu0 }
 0x1ba   :  { %v4114_v43 = vpop.eup %4113  ;;  %4133 = vtanh.f32 %v1376_v52  ;;  %v1447_v39 = vadd.f32 %v1446_v20, %v5150_v40  ;;  %v1448_v15 = vpop.f32.mrb[33].mxu0  ;;  %3480 = vmatmul.mubr.msk.f32.vlgmr.msra.gmra.mrb[68].mxu0 %vm655_vm0, %v5191_v62 }
 0x1bb   :  { %v4116_v47 = vpop.eup %4115  ;;  %4135 = vtanh.f32 %v1378_v44  ;;  %v1535_v37 = vpop.f32.mrb[32].mxu1  ;;  %v1449_v41 = vadd.f32 %v1448_v15, %v5150_v40  ;;  %v3670_v53 = vpack.c.bf16 %v4114_v43, %v4106_v19  ;;  %2720 = vmatprep.mubr.f32.mxu0 %v4295_v14 }
 0x1bc   :  { %v4118_v6 = vpop.eup %4117  ;;  %4137 = vtanh.f32 %v1447_v39  ;;  %v1536_v46 = vadd.f32 %v1535_v37, %v5150_v40  ;;  %v1537_v58 = vpop.f32.mrb[33].mxu1  ;;  %3481 = vmatmul.mubr.msk.f32.vlgmr.msra.gmra.mrb[68].mxu1 %vm655_vm0, %v5191_v62  ;;  %v3668_v56 = vpack.c.bf16 %v4116_v47, %v4108_v59 }
 0x1bd   :  { %v4120_v48 = vpop.eup %4119  ;;  %4139 = vtanh.f32 %v1449_v41  ;;  %v1538_v55 = vadd.f32 %v1537_v58, %v5150_v40  ;;  %v1452_v54 = vpop.f32.mrb[34].mxu0  ;;  %v3678_v57 = vpack.c.bf16 %v4118_v6, %v4110_v31  ;;  %2791 = vmatprep.mubr.f32.mxu1 %v4295_v14 }
 0x1be   :  { %v4122_v60 = vpop.eup %4121  ;;  %4141 = vtanh.f32 %v1536_v46  ;;  %v1453_v2 = vadd.f32 %v1452_v54, %v5155_v50  ;;  %v1454_v17 = vpop.f32.mrb[35].mxu0  ;;  %3669 = vmatprep.subr.bf16.mxu0 %v3668_v56  ;;  %v3676_v18 = vpack.c.bf16 %v4120_v48, %v4112_v34 }
 0x1bf   :  { %v4124_v0 = vpop.eup %4123  ;;  %4143 = vtanh.f32 %v1538_v55  ;;  %v1541_v61 = vpop.f32.mrb[34].mxu1  ;;  %v1455_v3 = vadd.f32 %v1454_v17, %v5155_v50  ;;  %3671 = vmatpush1.bf16.msra.mxu0 %v3670_v53 }
 0x1c0   :  { %v4126_v4 = vpop.eup %4125  ;;  %4145 = vtanh.f32 %v1453_v2  ;;  %v1542_v5 = vadd.f32 %v1541_v61, %v5155_v50  ;;  %v1543_v13 = vpop.f32.mrb[35].mxu1  ;;  %3677 = vmatprep.subr.bf16.mxu1 %v3676_v18 }
 0x1c1   :  { %v4128_v33 = vpop.eup %4127  ;;  %4147 = vtanh.f32 %v1455_v3  ;;  %v1544_v7 = vadd.f32 %v1543_v13, %v5155_v50  ;;  %3679 = vmatpush1.bf16.msra.mxu1 %v3678_v57  ;;  %v1458_v8 = vpop.f32.mrb[36].mxu0 }
 0x1c2   :  { %v4130_v10 = vpop.eup %4129  ;;  %4149 = vtanh.f32 %v1542_v5  ;;  %v1459_v1 = vadd.f32 %v1458_v8, %v5161_v29  ;;  %v1460_v12 = vpop.f32.mrb[37].mxu0 }
 0x1c3   :  { %v4132_v27 = vpop.eup %4131  ;;  %4151 = vtanh.f32 %v1544_v7  ;;  %v1547_v36 = vpop.f32.mrb[36].mxu1  ;;  %v1461_v42 = vadd.f32 %v1460_v12, %v5161_v29  ;;  %v3674_v49 = vpack.c.bf16 %v4130_v10, %v4122_v60 }
 0x1c4   :  { %v4134_v9 = vpop.eup %4133  ;;  %4153 = vtanh.f32 %v1459_v1  ;;  %v1548_v16 = vadd.f32 %v1547_v36, %v5161_v29  ;;  %v1549_v63 = vpop.f32.mrb[37].mxu1  ;;  %v3672_v23 = vpack.c.bf16 %v4132_v27, %v4124_v0 }
 0x1c5   :  { %v4136_v45 = vpop.eup %4135  ;;  %4155 = vtanh.f32 %v1461_v42  ;;  %v1550_v51 = vadd.f32 %v1549_v63, %v5161_v29  ;;  %v1464_v26 = vpop.f32.mrb[38].mxu0  ;;  %v3682_v24 = vpack.c.bf16 %v4134_v9, %v4126_v4 }
 0x1c6   :  { %v4138_v25 = vpop.eup %4137  ;;  %4157 = vtanh.f32 %v1548_v16  ;;  %v1465_v35 = vadd.f32 %v1464_v26, %v5167_v21  ;;  %v1466_v19 = vpop.f32.mrb[39].mxu0  ;;  %3673 = vmatprep.subr.bf16.mxu0 %v3672_v23  ;;  %v3680_v28 = vpack.c.bf16 %v4136_v45, %v4128_v33 }
 0x1c7   :  { %v4140_v30 = vpop.eup %4139  ;;  %4159 = vtanh.f32 %v1550_v51  ;;  %v1553_v38 = vpop.f32.mrb[38].mxu1  ;;  %v1467_v59 = vadd.f32 %v1466_v19, %v5167_v21  ;;  %3675 = vmatpush1.bf16.msra.mxu0 %v3674_v49 }
 0x1c8   :  { %v4142_v32 = vpop.eup %4141  ;;  %4161 = vtanh.f32 %v1465_v35  ;;  %v1554_v11 = vadd.f32 %v1553_v38, %v5167_v21  ;;  %v1555_v31 = vpop.f32.mrb[39].mxu1  ;;  %3681 = vmatprep.subr.bf16.mxu1 %v3680_v28 }
 0x1c9   :  { %v4144_v52 = vpop.eup %4143  ;;  %4163 = vtanh.f32 %v1467_v59  ;;  %v1556_v22 = vadd.f32 %v1555_v31, %v5167_v21  ;;  %3683 = vmatpush1.bf16.msra.mxu1 %v3682_v24  ;;  %v1624_v34 = vpop.f32.mrb[40].mxu0 }
 0x1ca   :  { %v4146_v44 = vpop.eup %4145  ;;  %4165 = vtanh.f32 %v1554_v11  ;;  %v1625_v20 = vadd.f32 %v1624_v34, %v5150_v40  ;;  %v1626_v43 = vpop.f32.mrb[41].mxu0  ;;  %3482 = vmatmul.mubr.msk.f32.vlgmr.msra.gmra.mrb[70].mxu0 %vm655_vm0, %v5191_v62 }
 0x1cb   :  { %v4148_v39 = vpop.eup %4147  ;;  %4167 = vtanh.f32 %v1556_v22  ;;  %v1713_v15 = vpop.f32.mrb[40].mxu1  ;;  %v1627_v47 = vadd.f32 %v1626_v43, %v5150_v40  ;;  %v3686_v37 = vpack.c.bf16 %v4146_v44, %v4138_v25  ;;  %2862 = vmatprep.mubr.f32.mxu0 %v4295_v14 }
 0x1cc   :  { %v4150_v41 = vpop.eup %4149  ;;  %4169 = vtanh.f32 %v1625_v20  ;;  %v1714_v53 = vadd.f32 %v1713_v15, %v5150_v40  ;;  %v1715_v6 = vpop.f32.mrb[41].mxu1  ;;  %3483 = vmatmul.mubr.msk.f32.vlgmr.msra.gmra.mrb[70].mxu1 %vm655_vm0, %v5191_v62  ;;  %v3684_v46 = vpack.c.bf16 %v4148_v39, %v4140_v30 }
 0x1cd   :  { %v4152_v58 = vpop.eup %4151  ;;  %4171 = vtanh.f32 %v1627_v47  ;;  %v1716_v56 = vadd.f32 %v1715_v6, %v5150_v40  ;;  %v1630_v48 = vpop.f32.mrb[42].mxu0  ;;  %v3694_v55 = vpack.c.bf16 %v4150_v41, %v4142_v32  ;;  %2933 = vmatprep.mubr.f32.mxu1 %v4295_v14 }
 0x1ce   :  { %v4154_v54 = vpop.eup %4153  ;;  %4173 = vtanh.f32 %v1714_v53  ;;  %v1631_v57 = vadd.f32 %v1630_v48, %v5155_v50  ;;  %v1632_v60 = vpop.f32.mrb[43].mxu0  ;;  %3685 = vmatprep.subr.bf16.mxu0 %v3684_v46  ;;  %v3692_v2 = vpack.c.bf16 %v4152_v58, %v4144_v52 }
 0x1cf   :  { %v4156_v17 = vpop.eup %4155  ;;  %4175 = vtanh.f32 %v1716_v56  ;;  %v1719_v18 = vpop.f32.mrb[42].mxu1  ;;  %v1633_v0 = vadd.f32 %v1632_v60, %v5155_v50  ;;  %3687 = vmatpush1.bf16.msra.mxu0 %v3686_v37 }
 0x1d0   :  { %v4158_v61 = vpop.eup %4157  ;;  %4177 = vtanh.f32 %v1631_v57  ;;  %v1720_v3 = vadd.f32 %v1719_v18, %v5155_v50  ;;  %v1721_v4 = vpop.f32.mrb[43].mxu1  ;;  %3693 = vmatprep.subr.bf16.mxu1 %v3692_v2 }
 0x1d1   :  { %v4160_v5 = vpop.eup %4159  ;;  %4179 = vtanh.f32 %v1633_v0  ;;  %v1722_v13 = vadd.f32 %v1721_v4, %v5155_v50  ;;  %3695 = vmatpush1.bf16.msra.mxu1 %v3694_v55  ;;  %v1636_v33 = vpop.f32.mrb[44].mxu0 }
 0x1d2   :  { %v4162_v7 = vpop.eup %4161  ;;  %4181 = vtanh.f32 %v1720_v3  ;;  %v1637_v8 = vadd.f32 %v1636_v33, %v5161_v29  ;;  %v1638_v10 = vpop.f32.mrb[45].mxu0 }
 0x1d3   :  { %v4164_v1 = vpop.eup %4163  ;;  %4183 = vtanh.f32 %v1722_v13  ;;  %v1725_v12 = vpop.f32.mrb[44].mxu1  ;;  %v1639_v27 = vadd.f32 %v1638_v10, %v5161_v29  ;;  %v3690_v36 = vpack.c.bf16 %v4162_v7, %v4154_v54 }
 0x1d4   :  { %v4166_v42 = vpop.eup %4165  ;;  %4185 = vtanh.f32 %v1637_v8  ;;  %v1726_v49 = vadd.f32 %v1725_v12, %v5161_v29  ;;  %v1727_v9 = vpop.f32.mrb[45].mxu1  ;;  %v3688_v16 = vpack.c.bf16 %v4164_v1, %v4156_v17 }
 0x1d5   :  { %v4168_v63 = vpop.eup %4167  ;;  %4187 = vtanh.f32 %v1639_v27  ;;  %v1728_v23 = vadd.f32 %v1727_v9, %v5161_v29  ;;  %v1642_v45 = vpop.f32.mrb[46].mxu0  ;;  %v3698_v51 = vpack.c.bf16 %v4166_v42, %v4158_v61 }
 0x1d6   :  { %v4170_v26 = vpop.eup %4169  ;;  %4189 = vtanh.f32 %v1726_v49  ;;  %v1643_v24 = vadd.f32 %v1642_v45, %v5167_v21  ;;  %v1644_v25 = vpop.f32.mrb[47].mxu0  ;;  %3689 = vmatprep.subr.bf16.mxu0 %v3688_v16  ;;  %v3696_v35 = vpack.c.bf16 %v4168_v63, %v4160_v5 }
 0x1d7   :  { %v4172_v19 = vpop.eup %4171  ;;  %4191 = vtanh.f32 %v1728_v23  ;;  %v1731_v28 = vpop.f32.mrb[46].mxu1  ;;  %v1645_v30 = vadd.f32 %v1644_v25, %v5167_v21  ;;  %3691 = vmatpush1.bf16.msra.mxu0 %v3690_v36 }
 0x1d8   :  { %v4174_v38 = vpop.eup %4173  ;;  %4193 = vtanh.f32 %v1643_v24  ;;  %v1732_v59 = vadd.f32 %v1731_v28, %v5167_v21  ;;  %v1733_v32 = vpop.f32.mrb[47].mxu1  ;;  %3697 = vmatprep.subr.bf16.mxu1 %v3696_v35 }
 0x1d9   :  { %v4176_v11 = vpop.eup %4175  ;;  %4195 = vtanh.f32 %v1645_v30  ;;  %v1734_v31 = vadd.f32 %v1733_v32, %v5167_v21  ;;  %3699 = vmatpush1.bf16.msra.mxu1 %v3698_v51  ;;  %v1802_v52 = vpop.f32.mrb[48].mxu0 }
 0x1da   :  { %v4178_v22 = vpop.eup %4177  ;;  %4197 = vtanh.f32 %v1732_v59  ;;  %v1803_v34 = vadd.f32 %v1802_v52, %v5150_v40  ;;  %v1804_v44 = vpop.f32.mrb[49].mxu0  ;;  %3484 = vmatmul.mubr.msk.f32.vlgmr.msra.gmra.mrb[72].mxu0 %vm655_vm0, %v5191_v62 }
 0x1db   :  { %v4180_v20 = vpop.eup %4179  ;;  %4199 = vtanh.f32 %v1734_v31  ;;  %v1891_v43 = vpop.f32.mrb[48].mxu1  ;;  %v1805_v39 = vadd.f32 %v1804_v44, %v5150_v40  ;;  %v3702_v15 = vpack.c.bf16 %v4178_v22, %v4170_v26  ;;  %3004 = vmatprep.mubr.f32.mxu0 %v4295_v14 }
 0x1dc   :  { %v4182_v47 = vpop.eup %4181  ;;  %4201 = vtanh.f32 %v1803_v34  ;;  %v1892_v37 = vadd.f32 %v1891_v43, %v5150_v40  ;;  %v1893_v41 = vpop.f32.mrb[49].mxu1  ;;  %3485 = vmatmul.mubr.msk.f32.vlgmr.msra.gmra.mrb[72].mxu1 %vm655_vm0, %v5191_v62  ;;  %v3700_v53 = vpack.c.bf16 %v4180_v20, %v4172_v19 }
 0x1dd   :  { %v4184_v6 = vpop.eup %4183  ;;  %4203 = vtanh.f32 %v1805_v39  ;;  %v1894_v46 = vadd.f32 %v1893_v41, %v5150_v40  ;;  %v1808_v58 = vpop.f32.mrb[50].mxu0  ;;  %v3710_v56 = vpack.c.bf16 %v4182_v47, %v4174_v38  ;;  %3075 = vmatprep.mubr.f32.mxu1 %v4295_v14 }
 0x1de   :  { %v4186_v48 = vpop.eup %4185  ;;  %4205 = vtanh.f32 %v1892_v37  ;;  %v1809_v55 = vadd.f32 %v1808_v58, %v5155_v50  ;;  %v1810_v54 = vpop.f32.mrb[51].mxu0  ;;  %3701 = vmatprep.subr.bf16.mxu0 %v3700_v53  ;;  %v3708_v57 = vpack.c.bf16 %v4184_v6, %v4176_v11 }
 0x1df   :  { %v4188_v60 = vpop.eup %4187  ;;  %4207 = vtanh.f32 %v1894_v46  ;;  %v1897_v2 = vpop.f32.mrb[50].mxu1  ;;  %v1811_v17 = vadd.f32 %v1810_v54, %v5155_v50  ;;  %3703 = vmatpush1.bf16.msra.mxu0 %v3702_v15 }
 0x1e0   :  { %v4190_v18 = vpop.eup %4189  ;;  %4209 = vtanh.f32 %v1809_v55  ;;  %v1898_v0 = vadd.f32 %v1897_v2, %v5155_v50  ;;  %v1899_v61 = vpop.f32.mrb[51].mxu1  ;;  %3709 = vmatprep.subr.bf16.mxu1 %v3708_v57 }
 0x1e1   :  { %v4192_v3 = vpop.eup %4191  ;;  %4211 = vtanh.f32 %v1811_v17  ;;  %v1900_v4 = vadd.f32 %v1899_v61, %v5155_v50  ;;  %3711 = vmatpush1.bf16.msra.mxu1 %v3710_v56  ;;  %v1814_v5 = vpop.f32.mrb[52].mxu0 }
 0x1e2   :  { %v4194_v13 = vpop.eup %4193  ;;  %4213 = vtanh.f32 %v1898_v0  ;;  %v1815_v33 = vadd.f32 %v1814_v5, %v5161_v29  ;;  %v1816_v7 = vpop.f32.mrb[53].mxu0 }
 0x1e3   :  { %v4196_v8 = vpop.eup %4195  ;;  %4215 = vtanh.f32 %v1900_v4  ;;  %v1903_v10 = vpop.f32.mrb[52].mxu1  ;;  %v1817_v1 = vadd.f32 %v1816_v7, %v5161_v29  ;;  %v3706_v12 = vpack.c.bf16 %v4194_v13, %v4186_v48 }
 0x1e4   :  { %v4198_v27 = vpop.eup %4197  ;;  %4217 = vtanh.f32 %v1815_v33  ;;  %v1904_v36 = vadd.f32 %v1903_v10, %v5161_v29  ;;  %v1905_v42 = vpop.f32.mrb[53].mxu1  ;;  %v3704_v49 = vpack.c.bf16 %v4196_v8, %v4188_v60 }
 0x1e5   :  { %v4200_v9 = vpop.eup %4199  ;;  %4219 = vtanh.f32 %v1817_v1  ;;  %v1906_v16 = vadd.f32 %v1905_v42, %v5161_v29  ;;  %v1820_v63 = vpop.f32.mrb[54].mxu0  ;;  %v3714_v23 = vpack.c.bf16 %v4198_v27, %v4190_v18 }
 0x1e6   :  { %v4202_v45 = vpop.eup %4201  ;;  %4221 = vtanh.f32 %v1904_v36  ;;  %v1821_v51 = vadd.f32 %v1820_v63, %v5167_v21  ;;  %v1822_v26 = vpop.f32.mrb[55].mxu0  ;;  %3705 = vmatprep.subr.bf16.mxu0 %v3704_v49  ;;  %v3712_v24 = vpack.c.bf16 %v4200_v9, %v4192_v3 }
 0x1e7   :  { %v4204_v25 = vpop.eup %4203  ;;  %4223 = vtanh.f32 %v1906_v16  ;;  %v1909_v35 = vpop.f32.mrb[54].mxu1  ;;  %v1823_v19 = vadd.f32 %v1822_v26, %v5167_v21  ;;  %3707 = vmatpush1.bf16.msra.mxu0 %v3706_v12 }
 0x1e8   :  { %v4206_v28 = vpop.eup %4205  ;;  %4225 = vtanh.f32 %v1821_v51  ;;  %v1910_v30 = vadd.f32 %v1909_v35, %v5167_v21  ;;  %v1911_v38 = vpop.f32.mrb[55].mxu1  ;;  %3713 = vmatprep.subr.bf16.mxu1 %v3712_v24 }
 0x1e9   :  { %v4208_v59 = vpop.eup %4207  ;;  %4227 = vtanh.f32 %v1823_v19  ;;  %v1912_v32 = vadd.f32 %v1911_v38, %v5167_v21  ;;  %3715 = vmatpush1.bf16.msra.mxu1 %v3714_v23  ;;  %v1980_v11 = vpop.f32.mrb[56].mxu0 }
 0x1ea   :  { %v4210_v31 = vpop.eup %4209  ;;  %4229 = vtanh.f32 %v1910_v30  ;;  %v1981_v52 = vadd.f32 %v1980_v11, %v5150_v40  ;;  %v1982_v22 = vpop.f32.mrb[57].mxu0  ;;  %3486 = vmatmul.mubr.msk.f32.vlgmr.msra.gmra.mrb[74].mxu0 %vm655_vm0, %v5191_v62 }
 0x1eb   :  { %v4212_v34 = vpop.eup %4211  ;;  %4231 = vtanh.f32 %v1912_v32  ;;  %v2069_v44 = vpop.f32.mrb[56].mxu1  ;;  %v1983_v20 = vadd.f32 %v1982_v22, %v5150_v40  ;;  %v3718_v43 = vpack.c.bf16 %v4210_v31, %v4202_v45  ;;  %3146 = vmatprep.mubr.f32.mxu0 %v4295_v14 }
 0x1ec   :  { %v4214_v39 = vpop.eup %4213  ;;  %4233 = vtanh.f32 %v1981_v52  ;;  %v2070_v15 = vadd.f32 %v2069_v44, %v5150_v40  ;;  %v2071_v47 = vpop.f32.mrb[57].mxu1  ;;  %3487 = vmatmul.mubr.msk.f32.vlgmr.msra.gmra.mrb[74].mxu1 %vm655_vm0, %v5191_v62  ;;  %v3716_v37 = vpack.c.bf16 %v4212_v34, %v4204_v25 }
 0x1ed   :  { %v4216_v41 = vpop.eup %4215  ;;  %4235 = vtanh.f32 %v1983_v20  ;;  %v2072_v53 = vadd.f32 %v2071_v47, %v5150_v40  ;;  %v1986_v6 = vpop.f32.mrb[58].mxu0  ;;  %v3726_v46 = vpack.c.bf16 %v4214_v39, %v4206_v28  ;;  %3217 = vmatprep.mubr.f32.mxu1 %v4295_v14  ;;  %v4269_v28 = vld [vmem:[%s5387_s5] sm:$0xff]  ;;  %s4296_s5 = smov [#allocation2]  }
 0x1ee   :  { %v4218_v58 = vpop.eup %4217  ;;  %4237 = vtanh.f32 %v2070_v15  ;;  %v1987_v56 = vadd.f32 %v1986_v6, %v5155_v50  ;;  %v1988_v48 = vpop.f32.mrb[59].mxu0  ;;  %3717 = vmatprep.subr.bf16.mxu0 %v3716_v37  ;;  %v3724_v55 = vpack.c.bf16 %v4216_v41, %v4208_v59  ;;  %s3404_s24 = sshll.u32 %s4296_s5, 4  ;;  %s3405_s24 = int_to_ptr.vmem [resolvable:$true] %s3404_s24 }
 0x1ef   :  { %v4220_v54 = vpop.eup %4219  ;;  %4239 = vtanh.f32 %v2072_v53  ;;  %v2075_v57 = vpop.f32.mrb[58].mxu1  ;;  %v1989_v62 = vadd.f32 %v1988_v48, %v5155_v50  ;;  %3719 = vmatpush1.bf16.msra.mxu0 %v3718_v43  ;;  %s4270_s4 = scalar_lea.vmem %s3405_s24, 4096  ;;  %p4275_p1 = scmp.lt.s32.totalorder %s3405_s24, %s3405_s24 }
 0x1f0   :  { %v4222_v60 = vpop.eup %4221  ;;  %4241 = vtanh.f32 %v1987_v56  ;;  %v2076_v40 = vadd.f32 %v2075_v57, %v5155_v50  ;;  %v2077_v2 = vpop.f32.mrb[59].mxu1  ;;  %3725 = vmatprep.subr.bf16.mxu1 %v3724_v55  ;;  %p4271_p0 = scmp.ne.s32.totalorder %s3405_s24, %s4270_s4  ;;  %p4276_p2 = scmp.lt.s32.totalorder %s4270_s4, %s4270_s4 }
 0x1f1   :  { %v4224_v17 = vpop.eup %4223  ;;  %4243 = vtanh.f32 %v1989_v62  ;;  %v2078_v18 = vadd.f32 %v2077_v2, %v5155_v50  ;;  %3727 = vmatpush1.bf16.msra.mxu1 %v3726_v46  ;;  %v1992_v0 = vpop.f32.mrb[60].mxu0 }
 0x1f2   :  { %v4226_v61 = vpop.eup %4225  ;;  %4245 = vtanh.f32 %v2076_v40  ;;  %v1993_v3 = vadd.f32 %v1992_v0, %v5161_v29  ;;  %v1994_v4 = vpop.f32.mrb[61].mxu0  ;;  %p4277_p3 = por %p4276_p2, %p4275_p1 }
 0x1f3   :  { %v4228_v5 = vpop.eup %4227  ;;  %4247 = vtanh.f32 %v2078_v18  ;;  %v2081_v13 = vpop.f32.mrb[60].mxu1  ;;  %v1995_v33 = vadd.f32 %v1994_v4, %v5161_v29  ;;  %v3722_v7 = vpack.c.bf16 %v4226_v61, %v4218_v58 }
 0x1f4   :  { %v4230_v8 = vpop.eup %4229  ;;  %4249 = vtanh.f32 %v1993_v3  ;;  %v2082_v10 = vadd.f32 %v2081_v13, %v5161_v29  ;;  %v2083_v1 = vpop.f32.mrb[61].mxu1  ;;  %v3720_v12 = vpack.c.bf16 %v4228_v5, %v4220_v54  ;;  %p4278_p4 = pnand %p4277_p3, %p4271_p0 }
 0x1f5   :  { %v4232_v50 = vpop.eup %4231  ;;  %4251 = vtanh.f32 %v1995_v33  ;;  %v2084_v27 = vadd.f32 %v2083_v1, %v5161_v29  ;;  %v1998_v36 = vpop.f32.mrb[62].mxu0  ;;  %v3730_v42 = vpack.c.bf16 %v4230_v8, %v4222_v60 }
 0x1f6   :  { %v4234_v49 = vpop.eup %4233  ;;  %4253 = vtanh.f32 %v2082_v10  ;;  %v1999_v9 = vadd.f32 %v1998_v36, %v5167_v21  ;;  %v2000_v16 = vpop.f32.mrb[63].mxu0  ;;  %3721 = vmatprep.subr.bf16.mxu0 %v3720_v12  ;;  %v3728_v63 = vpack.c.bf16 %v4232_v50, %v4224_v17 }
 0x1f7   :  { %v4236_v23 = vpop.eup %4235  ;;  %4255 = vtanh.f32 %v2084_v27  ;;  %v2087_v45 = vpop.f32.mrb[62].mxu1  ;;  %v2001_v51 = vadd.f32 %v2000_v16, %v5167_v21  ;;  %3723 = vmatpush1.bf16.msra.mxu0 %v3722_v7 }
 0x1f8   :  { %v4238_v26 = vpop.eup %4237  ;;  %4257 = vtanh.f32 %v1999_v9  ;;  %v2088_v24 = vadd.f32 %v2087_v45, %v5167_v21  ;;  %v2089_v29 = vpop.f32.mrb[63].mxu1  ;;  %3729 = vmatprep.subr.bf16.mxu1 %v3728_v63 }
 0x1f9   :  { %v4240_v25 = vpop.eup %4239  ;;  %4259 = vtanh.f32 %v2001_v51  ;;  %v2090_v35 = vadd.f32 %v2089_v29, %v5167_v21  ;;  %3731 = vmatpush1.bf16.msra.mxu1 %v3730_v42 }
 0x1fa   :  { %v4242_v19 = vpop.eup %4241  ;;  %4261 = vtanh.f32 %v2088_v24  ;;  %3488 = vmatmul.mubr.msk.f32.vlgmr.msra.gmra.mrb[76].mxu0 %vm655_vm0, %v4269_v28 }
 0x1fb   :  { %v4244_v30 = vpop.eup %4243  ;;  %4263 = vtanh.f32 %v2090_v35  ;;  %v3734_v38 = vpack.c.bf16 %v4242_v19, %v4234_v49  ;;  %3288 = vmatprep.mubr.f32.mxu0 %v4295_v14 }
 0x1fc   :  { %v4246_v59 = vpop.eup %4245  ;;  %3489 = vmatmul.mubr.msk.f32.vlgmr.msra.gmra.mrb[76].mxu1 %vm655_vm0, %v4269_v28  ;;  %v3732_v32 = vpack.c.bf16 %v4244_v30, %v4236_v23 }
 0x1fd   :  { %v4248_v11 = vpop.eup %4247  ;;  %v3742_v21 = vpack.c.bf16 %v4246_v59, %v4238_v26  ;;  %3359 = vmatprep.mubr.f32.mxu1 %v4295_v14  ;;  %v5336_v14 = vpop.permute.xlu0 %2224 }
 0x1fe   :  { %v4250_v31 = vpop.eup %4249  ;;  %3733 = vmatprep.subr.bf16.mxu0 %v3732_v32  ;;  %v3740_v52 = vpack.c.bf16 %v4248_v11, %v4240_v25 }
 0x1ff   :  { %v4252_v22 = vpop.eup %4251  ;;  %3735 = vmatpush1.bf16.msra.mxu0 %v3734_v38 }
 0x200   :  { %v4254_v34 = vpop.eup %4253  ;;  %3741 = vmatprep.subr.bf16.mxu1 %v3740_v52 }
 0x201   :  { %v4256_v44 = vpop.eup %4255  ;;  %3743 = vmatpush1.bf16.msra.mxu1 %v3742_v21 }
 0x202   :  { %v4258_v20 = vpop.eup %4257 }
 0x203   :  { %v4260_v43 = vpop.eup %4259  ;;  %v3738_v39 = vpack.c.bf16 %v4258_v20, %v4250_v31 }
 0x204   :  { %v4262_v15 = vpop.eup %4261  ;;  %v3736_v47 = vpack.c.bf16 %v4260_v43, %v4252_v22 }
 0x205   :  { %v4264_v37 = vpop.eup %4263  ;;  %v3746_v41 = vpack.c.bf16 %v4262_v15, %v4254_v34 }
 0x206   :  { %3737 = vmatprep.subr.bf16.mxu0 %v3736_v47  ;;  %v3744_v53 = vpack.c.bf16 %v4264_v37, %v4256_v44 }
 0x207   :  { %3739 = vmatpush1.bf16.msra.mxu0 %v3738_v39 }
 0x208   :  { %3745 = vmatprep.subr.bf16.mxu1 %v3744_v53 }
 0x209   :  { %3747 = vmatpush1.bf16.msra.mxu1 %v3746_v41 }
 0x20a   :  { %3490 = vmatmul.mubr.msk.f32.vlgmr.msra.gmra.mrb[78].mxu0 %vm655_vm0, %v4269_v28 }
 0x20c   :  { %3491 = vmatmul.mubr.msk.f32.vlgmr.msra.gmra.mrb[78].mxu1 %vm655_vm0, %v4269_v28 }
 0x26d   :  { %v2296_v6 = vpop.f32.mrb[64].mxu0 }
 0x26e   :  { %v2297_v46 = vadd.f32 %v2296_v6, %v5336_v14  ;;  %v2298_v58 = vpop.f32.mrb[65].mxu0 }
 0x26f   :  { %v2367_v56 = vpop.f32.mrb[64].mxu1  ;;  %v2299_v48 = vadd.f32 %v2298_v58, %v5336_v14 }
 0x270   :  { %3366 = vst [vmem:[#allocation2] sm:$0xff] %v2297_v46  ;;  %v2368_v55 = vadd.f32 %v2367_v56, %v5336_v14  ;;  %v2369_v54 = vpop.f32.mrb[65].mxu1 }
 0x271   :  { %3367 = vst [vmem:[#allocation2 + $0x8] sm:$0xff] %v2299_v48  ;;  %v2370_v57 = vadd.f32 %v2369_v54, %v5336_v14 }
 0x272   :  { %3368 = vst [vmem:[#allocation2 + $0x10] sm:$0xff] %v2368_v55 }
 0x273   :  { %3369 = vst [vmem:[#allocation2 + $0x18] sm:$0xff] %v2370_v57 }
 0x27d   :  { %v2438_v62 = vpop.f32.mrb[66].mxu0 }
 0x27e   :  { %v2439_v60 = vadd.f32 %v2438_v62, %v5336_v14  ;;  %v2440_v40 = vpop.f32.mrb[67].mxu0 }
 0x27f   :  { %v2509_v2 = vpop.f32.mrb[66].mxu1  ;;  %v2441_v17 = vadd.f32 %v2440_v40, %v5336_v14 }
 0x280   :  { %3370 = vst [vmem:[#allocation2 + $0x20] sm:$0xff] %v2439_v60  ;;  %v2510_v18 = vadd.f32 %v2509_v2, %v5336_v14  ;;  %v2511_v0 = vpop.f32.mrb[67].mxu1 }
 0x281   :  { %3371 = vst [vmem:[#allocation2 + $0x28] sm:$0xff] %v2441_v17  ;;  %v2512_v61 = vadd.f32 %v2511_v0, %v5336_v14 }
 0x282   :  { %3372 = vst [vmem:[#allocation2 + $0x30] sm:$0xff] %v2510_v18 }
 0x283   :  { %3373 = vst [vmem:[#allocation2 + $0x38] sm:$0xff] %v2512_v61 }
 0x28d   :  { %v2580_v3 = vpop.f32.mrb[68].mxu0 }
 0x28e   :  { %v2581_v4 = vadd.f32 %v2580_v3, %v5336_v14  ;;  %v2582_v5 = vpop.f32.mrb[69].mxu0 }
 0x28f   :  { %v2651_v13 = vpop.f32.mrb[68].mxu1  ;;  %v2583_v33 = vadd.f32 %v2582_v5, %v5336_v14 }
 0x290   :  { %3374 = vst [vmem:[#allocation2 + $0x40] sm:$0xff] %v2581_v4  ;;  %v2652_v7 = vadd.f32 %v2651_v13, %v5336_v14  ;;  %v2653_v8 = vpop.f32.mrb[69].mxu1 }
 0x291   :  { %3375 = vst [vmem:[#allocation2 + $0x48] sm:$0xff] %v2583_v33  ;;  %v2654_v10 = vadd.f32 %v2653_v8, %v5336_v14 }
 0x292   :  { %3376 = vst [vmem:[#allocation2 + $0x50] sm:$0xff] %v2652_v7 }
 0x293   :  { %3377 = vst [vmem:[#allocation2 + $0x58] sm:$0xff] %v2654_v10 }
 0x29d   :  { %v2722_v1 = vpop.f32.mrb[70].mxu0 }
 0x29e   :  { %v2723_v12 = vadd.f32 %v2722_v1, %v5336_v14  ;;  %v2724_v50 = vpop.f32.mrb[71].mxu0 }
 0x29f   :  { %v2793_v27 = vpop.f32.mrb[70].mxu1  ;;  %v2725_v36 = vadd.f32 %v2724_v50, %v5336_v14 }
 0x2a0   :  { %3378 = vst [vmem:[#allocation2 + $0x60] sm:$0xff] %v2723_v12  ;;  %v2794_v42 = vadd.f32 %v2793_v27, %v5336_v14  ;;  %v2795_v49 = vpop.f32.mrb[71].mxu1 }
 0x2a1   :  { %3379 = vst [vmem:[#allocation2 + $0x68] sm:$0xff] %v2725_v36  ;;  %v2796_v9 = vadd.f32 %v2795_v49, %v5336_v14 }
 0x2a2   :  { %3380 = vst [vmem:[#allocation2 + $0x70] sm:$0xff] %v2794_v42 }
 0x2a3   :  { %3381 = vst [vmem:[#allocation2 + $0x78] sm:$0xff] %v2796_v9 }
 0x2ad   :  { %v2864_v16 = vpop.f32.mrb[72].mxu0 }
 0x2ae   :  { %v2865_v63 = vadd.f32 %v2864_v16, %v5336_v14  ;;  %v2866_v23 = vpop.f32.mrb[73].mxu0 }
 0x2af   :  { %v2935_v45 = vpop.f32.mrb[72].mxu1  ;;  %v2867_v51 = vadd.f32 %v2866_v23, %v5336_v14 }
 0x2b0   :  { %3382 = vst [vmem:[#allocation2 + $0x80] sm:$0xff] %v2865_v63  ;;  %v2936_v26 = vadd.f32 %v2935_v45, %v5336_v14  ;;  %v2937_v24 = vpop.f32.mrb[73].mxu1 }
 0x2b1   :  { %3383 = vst [vmem:[#allocation2 + $0x88] sm:$0xff] %v2867_v51  ;;  %v2938_v29 = vadd.f32 %v2937_v24, %v5336_v14 }
 0x2b2   :  { %3384 = vst [vmem:[#allocation2 + $0x90] sm:$0xff] %v2936_v26 }
 0x2b3   :  { %3385 = vst [vmem:[#allocation2 + $0x98] sm:$0xff] %v2938_v29 }
 0x2bd   :  { %v3006_v25 = vpop.f32.mrb[74].mxu0 }
 0x2be   :  { %v3007_v35 = vadd.f32 %v3006_v25, %v5336_v14  ;;  %v3008_v19 = vpop.f32.mrb[75].mxu0 }
 0x2bf   :  { %v3077_v28 = vpop.f32.mrb[74].mxu1  ;;  %v3009_v30 = vadd.f32 %v3008_v19, %v5336_v14 }
 0x2c0   :  { %3386 = vst [vmem:[#allocation2 + $0xa0] sm:$0xff] %v3007_v35  ;;  %v3078_v38 = vadd.f32 %v3077_v28, %v5336_v14  ;;  %v3079_v59 = vpop.f32.mrb[75].mxu1 }
 0x2c1   :  { %3387 = vst [vmem:[#allocation2 + $0xa8] sm:$0xff] %v3009_v30  ;;  %v3080_v32 = vadd.f32 %v3079_v59, %v5336_v14 }
 0x2c2   :  { %3388 = vst [vmem:[#allocation2 + $0xb0] sm:$0xff] %v3078_v38 }
 0x2c3   :  { %3389 = vst [vmem:[#allocation2 + $0xb8] sm:$0xff] %v3080_v32 }
 0x2cd   :  { %v3148_v11 = vpop.f32.mrb[76].mxu0 }
 0x2ce   :  { %v3149_v21 = vadd.f32 %v3148_v11, %v5336_v14  ;;  %v3150_v31 = vpop.f32.mrb[77].mxu0 }
 0x2cf   :  { %v3219_v52 = vpop.f32.mrb[76].mxu1  ;;  %v3151_v22 = vadd.f32 %v3150_v31, %v5336_v14 }
 0x2d0   :  { %3390 = vst [vmem:[#allocation2 + $0xc0] sm:$0xff] %v3149_v21  ;;  %v3220_v34 = vadd.f32 %v3219_v52, %v5336_v14  ;;  %v3221_v44 = vpop.f32.mrb[77].mxu1 }
 0x2d1   :  { %3391 = vst [vmem:[#allocation2 + $0xc8] sm:$0xff] %v3151_v22  ;;  %v3222_v20 = vadd.f32 %v3221_v44, %v5336_v14 }
 0x2d2   :  { %3392 = vst [vmem:[#allocation2 + $0xd0] sm:$0xff] %v3220_v34 }
 0x2d3   :  { %3393 = vst [vmem:[#allocation2 + $0xd8] sm:$0xff] %v3222_v20 }
 0x2dd   :  { %v3290_v43 = vpop.f32.mrb[78].mxu0 }
 0x2de   :  { %v3291_v39 = vadd.f32 %v3290_v43, %v5336_v14  ;;  %v3292_v15 = vpop.f32.mrb[79].mxu0 }
 0x2df   :  { %v3361_v47 = vpop.f32.mrb[78].mxu1  ;;  %v3293_v37 = vadd.f32 %v3292_v15, %v5336_v14 }
 0x2e0   :  { %3394 = vst [vmem:[#allocation2 + $0xe0] sm:$0xff] %v3291_v39  ;;  %v3362_v41 = vadd.f32 %v3361_v47, %v5336_v14  ;;  %v3363_v53 = vpop.f32.mrb[79].mxu1 }
 0x2e1   :  { %3395 = vst [vmem:[#allocation2 + $0xe8] sm:$0xff] %v3293_v37  ;;  %v3364_v6 = vadd.f32 %v3363_v53, %v5336_v14 }
 0x2e2   :  { %3396 = vst [vmem:[#allocation2 + $0xf0] sm:$0xff] %v3362_v41 }
 0x2e3   :  { %3397 = vst [vmem:[#allocation2 + $0xf8] sm:$0xff] %v3364_v6 }
 0x2e4   :  { %4281 = shalt.err (!%p4278_p4)
}
 0x2e5   :  { %s4282_s26 = scalar_lea.hbm %s5389_s7, 4096 }
 0x2e6   :  { %p4283_p5 = scmp.ne.s32.totalorder %s5389_s7, %s4282_s26  ;;  %p4286_p6 = scmp.lt.u32.totalorder %s4282_s26, %s5389_s7 }
 0x2e8   :  { %p4288_p7 = pnand %p4286_p6, %p4283_p5 }
 0x2ea   :  { %4291 = shalt.err (!%p4288_p7)
}
 0x2eb   :  { %3407 = dma.vmem_to_hbm [thread:$0]  %s3405_s24, 4096, %s5389_s7, [#allocation3]  }
 0x2ec   :  { %4292 = dma.done.wait [#allocation3], 4096  }
 0x2ed   :  { %4293 = vsyncadd [#allocation3], 4294963200 }
 0x2ee   :  { %3411 = vsyncpa [#allocation3], 1 }

</bundles_post_ra>
